<compile_context>
chip_gen: v5e
topology: v5e:2x2
jax: 0.10.0
libtpu: 0.0.40
codegen_flags: <defaults>
</compile_context>

<pallas_src>
import functools
import math

import numpy as np
import jax
import jax.numpy as jnp
from jax import lax
from jax.experimental import pallas as pl
from jax.experimental.pallas import tpu as pltpu


# ----------------------------- Pallas kernel --------------------------------


def _mixcon_rowstats_kernel(feat_ref, lm_ref,                 # inputs
                            m_out, s_out, b_out,              # outputs (last-k write)
                            m_acc, s_acc, b_acc,              # VMEM accumulators
                            *, tm, tn, m_valid):
    """Per row i of the (padded) MxM similarity matrix, accumulated over column
    tiles k:

        m = max_j sim[i, j]                 (diag included)
        s = sum_{j < M} exp(sim[i,j] - m)   (diag still included; the wrapper
                                             removes it in closed form)
        b = sum_j sim[i,j] * lm_nd[i,j]     (lm_nd = label mask, diag & padding 0)

    sim = feat_s @ feat_s.T with feat_s = feat * sqrt(1/T) in bf16, one (tm, tn)
    tile per grid step on the MXU with f32 accumulation.
    """
    i = pl.program_id(0)
    k = pl.program_id(1)

    @pl.when(k == 0)
    def _init():
        m_acc[...] = jnp.full(m_acc.shape, -jnp.inf, m_acc.dtype)
        s_acc[...] = jnp.zeros(s_acc.shape, s_acc.dtype)
        b_acc[...] = jnp.zeros(b_acc.shape, b_acc.dtype)

    row_start = pl.multiple_of(i * tm, tm)
    col_start = pl.multiple_of(k * tn, tn)

    # Skip tiles that are 100% padding (row or column block entirely beyond M).
    @pl.when(jnp.logical_and(row_start < m_valid, col_start < m_valid))
    def _compute():
        q = feat_ref[pl.ds(row_start, tm), :]       # (tm, Kp) bf16 rows
        cols = feat_ref[pl.ds(col_start, tn), :]    # (tn, Kp) bf16 columns
        sim = lax.dot_general(q, cols, (((1,), (1,)), ((), ())),
                              preferred_element_type=jnp.float32)   # (tm, tn)

        # Online row max.  Padded columns inside a valid tile contribute
        # sim == 0, which never exceeds the (always included) diagonal; and any
        # finite m cancels analytically in ((b - m*c) - log(s)*c)/d anyway.
        m_old = m_acc[...]
        m_new = jnp.maximum(m_old, sim.max(axis=1, keepdims=True))
        alpha = jnp.exp(m_old - m_new)               # m_new always finite here

        # Softmax denominator: exclude padded columns of the boundary tile
        # (M is static); the diagonal stays in and is removed in the wrapper.
        col_ids = col_start + lax.broadcasted_iota(jnp.int32, (1, tn), 1)
        p = jnp.where(col_ids < m_valid, jnp.exp(sim - m_new), 0.0)

        # Mask-weighted row sum.  lm is binary {0,1} int8 with the diagonal and
        # all padding pre-zeroed, so no extra masking is needed here.  (The mask
        # row sums themselves are hoisted to the wrapper.)
        lm = lm_ref[...].astype(jnp.float32)

        s_acc[...] = s_acc[...] * alpha + p.sum(axis=1, keepdims=True)
        b_acc[...] = b_acc[...] + (sim * lm).sum(axis=1, keepdims=True)
        m_acc[...] = m_new

    @pl.when(k == pl.num_programs(1) - 1)
    def _writeback():
        m_out[...] = m_acc[...]
        s_out[...] = s_acc[...]
        b_out[...] = b_acc[...]


# ------------------------------- JAX glue ------------------------------------


def _block_diag_int8(mats):
    mats = [jnp.asarray(m).astype(jnp.int8) for m in mats]
    if not mats:
        return jnp.zeros((0, 0), jnp.int8)
    n = sum(m.shape[0] for m in mats)
    c = sum(m.shape[1] for m in mats)
    out = jnp.zeros((n, c), jnp.int8)
    r0 = c0 = 0
    for m in mats:
        out = out.at[r0:r0 + m.shape[0], c0:c0 + m.shape[1]].set(m)
        r0 += m.shape[0]
        c0 += m.shape[1]
    return out


def _get_reweight_func(option):
    if option == 'none':
        return lambda iou: jnp.ones_like(iou)
    if option == 'linear':
        return lambda iou: iou
    if option == 'exp':
        return lambda iou: jnp.exp(iou) - 1.0
    raise ValueError(option)


def _round_up(x, m):
    return ((x + m - 1) // m) * m


def mixcon_loss(pos_feat, pos_labels, ious_pos, neg_feat, neg_iou,
                temperature=0.2, iou_threshold=0.5, reweight_func='none',
                tm=None, tn=None):
    """JAX/Pallas equivalent of MixConLoss.forward.

    MXU operands are bf16 (f32 accumulation) and carry sqrt(1/temperature); the
    label masks are assumed binary ({0,1}), as produced by torch.eq / IoU
    thresholding.
    """
    neg_mask, neg_obj_mask = neg_iou
    neg_mask = [m for m in neg_mask if m.shape[0] > 0]
    neg_feat0 = jnp.asarray(neg_feat[0], jnp.float32)
    neg_feat1 = jnp.asarray(neg_feat[1], jnp.float32)
    ious_neg = jnp.ones_like(neg_feat0[:, 0])

    pos_feat = jnp.asarray(pos_feat, jnp.float32)
    pos_labels = jnp.asarray(pos_labels).reshape(-1, 1)

    # (eager boolean indexing = host-side glue, matches torch's advanced indexing)
    all_feat = jnp.concatenate([
        pos_feat,
        neg_feat0,
        neg_feat1[neg_obj_mask == 1],
        neg_feat1[neg_obj_mask == 0],
    ], axis=0).astype(jnp.float32)
    M, K = all_feat.shape

    # ---- label mask: built compactly in int8, no full MxM f32 intermediates ----
    label_mask_pos = (pos_labels == pos_labels.T).astype(jnp.int8)
    P = label_mask_pos.shape[0]
    label_mask_neg = _block_diag_int8(neg_mask)
    if len(neg_mask) > 0 and P > 0:
        sub_mask = _block_diag_int8(
            [label_mask_pos, jnp.tile(label_mask_neg, (2, 2))])
    elif len(neg_mask) > 0:
        sub_mask = jnp.tile(label_mask_neg, (2, 2))
    else:
        sub_mask = label_mask_pos
    Ln = sub_mask.shape[0]                  # == label_number of the torch code

    # Label-mask row sums are feature independent -> hoisted out of the kernel.
    # d includes the diagonal (torch divides by label_mask.sum(1)); c excludes
    # it (the diagonal is also excluded from the log-prob numerator).
    ar_l = jnp.arange(Ln)
    d_sub = sub_mask.astype(jnp.int32).sum(axis=1).astype(jnp.float32)
    diag_sub = sub_mask[ar_l, ar_l].astype(jnp.float32)
    d = jnp.zeros((M,), jnp.float32).at[:Ln].set(d_sub)
    c = jnp.zeros((M,), jnp.float32).at[:Ln].set(d_sub - diag_sub)

    # ---- tiles & padding -------------------------------------------------------
    if tm is None or tn is None:
        t = 512 if M > 2048 else (256 if M > 256 else 128)
        tm = tm if tm is not None else t
        tn = tn if tn is not None else t
    step = tm * tn // math.gcd(tm, tn)      # tm == tn by default -> step == tm
    Mp = _round_up(max(M, 1), step)
    Kp = _round_up(max(K, 1), 128)

    # sqrt(1/T) folded into the single bf16 feature buffer (both MXU operands),
    # so sim == feat @ feat.T / T with no per-tile scaling work in the kernel.
    feat_scaled = (all_feat * (1.0 / math.sqrt(temperature))).astype(jnp.bfloat16)
    feat_pad = jnp.zeros((Mp, Kp), jnp.bfloat16).at[:M, :K].set(feat_scaled)

    # int8 label mask, diagonal pre-zeroed, zero padding (the only MxM stream).
    sub_nd = sub_mask.at[ar_l, ar_l].set(0)
    lm_pad = jnp.zeros((Mp, Mp), jnp.int8).at[:Ln, :Ln].set(sub_nd)

    kernel = functools.partial(_mixcon_rowstats_kernel, tm=tm, tn=tn, m_valid=M)
    grid = (Mp // tm, Mp // tn)
    # VMEM footprint (resident bf16 features + 2x int8 mask tiles + a few f32
    # tile intermediates) stays well under the 32 MiB scoped default on
    # v5e/v6e/v7x, so no explicit vmem_limit_bytes is needed.  (On v7x, if tiles
    # are enlarged, consider pipeline_mode=pl.Buffered(1) on the resident
    # feature spec.)
    m, s, b = pl.pallas_call(
        kernel,
        out_shape=[jax.ShapeDtypeStruct((Mp, 1), jnp.float32)] * 3,
        grid_spec=pltpu.PrefetchScalarGridSpec(
            num_scalar_prefetch=0,
            grid=grid,
            in_specs=[
                # features: whole (Mp, Kp) buffer VMEM resident (one DMA total)
                pl.BlockSpec((Mp, Kp), lambda i, k: (0, 0)),
                # int8 diag-zeroed label-mask tile
                pl.BlockSpec((tm, tn), lambda i, k: (i, k)),
            ],
            out_specs=[pl.BlockSpec((tm, 1), lambda i, k: (i, 0))] * 3,
            scratch_shapes=[pltpu.VMEM((tm, 1), jnp.float32)] * 3,
        ),
        compiler_params=pltpu.CompilerParams(
            dimension_semantics=("parallel", "arbitrary")),
    )(feat_pad, lm_pad)

    m = m[:M, 0]
    s = s[:M, 0]
    b = b[:M, 0]

    # Closed-form removal of the diagonal (self-similarity) term from the
    # softmax denominator, from the same bf16-rounded, sqrt(1/T)-scaled features
    # the MXU saw: sim[i,i] = sum_k feat_scaled[i,k]^2.
    diag_sim = jnp.sum(jnp.square(feat_scaled.astype(jnp.float32)), axis=1)
    s = s - jnp.exp(diag_sim - m)

    # per_label_log_prob_i = sum_j (sim - m - log s) * lm_nd / d
    #                      = ((b - m*c) - log(s)*c) / d
    # TODO(synk): if M == 1 a kept row has s == 0 (log -> -inf); torch has the
    # same degenerate behavior, so it is left unguarded.
    keep1 = d > 0
    per_label_log_prob = jnp.where(
        keep1, ((b - m * c) - jnp.log(s) * c) / jnp.where(keep1, d, 1.0), 0.0)

    ious = jnp.concatenate([jnp.asarray(ious_pos, jnp.float32), ious_neg])
    L = ious.shape[0]
    keep2 = ious >= iou_threshold
    coef = _get_reweight_func(reweight_func)(ious)

    # Torch: per_label_log_prob[keep1][:L][keep2], coef[keep2]; reproduced with
    # rank arithmetic + masked mean (avoids dynamic shapes).
    rank = jnp.cumsum(keep1.astype(jnp.int32))     # 1-indexed pos among kept rows
    idx = jnp.clip(rank - 1, 0, L - 1)
    sel = keep1 & (rank <= L) & keep2[idx]
    w = coef[idx]
    num = jnp.sum(jnp.where(sel, -per_label_log_prob * w, 0.0))
    den = jnp.sum(sel.astype(jnp.float32))
    return num / den                               # mean (NaN if empty, like torch)


# --------------------------- pure numpy reference ----------------------------


def _ref_loss_numpy(pos_feat, pos_labels, ious_pos, neg_feat, neg_iou,
                    temperature=0.2, iou_threshold=0.5):
    pos_feat = np.asarray(pos_feat, np.float32)
    pos_labels = np.asarray(pos_labels).reshape(-1, 1)
    ious_pos = np.asarray(ious_pos, np.float32)
    neg_feat0 = np.asarray(neg_feat[0], np.float32)
    neg_feat1 = np.asarray(neg_feat[1], np.float32)
    neg_mask, neg_obj_mask = neg_iou
    neg_mask = [np.asarray(mm, np.float32) for mm in neg_mask
                if np.asarray(mm).shape[0] > 0]
    neg_obj_mask = np.asarray(neg_obj_mask)

    def blkdiag(mats):
        if not mats:
            return np.zeros((0, 0), np.float32)
        n = sum(mm.shape[0] for mm in mats)
        c = sum(mm.shape[1] for mm in mats)
        out = np.zeros((n, c), np.float32)
        r0 = c0 = 0
        for mm in mats:
            out[r0:r0 + mm.shape[0], c0:c0 + mm.shape[1]] = mm
            r0 += mm.shape[0]
            c0 += mm.shape[1]
        return out

    label_mask_neg = blkdiag(neg_mask)
    ious_neg = np.ones_like(neg_feat0[:, 0])
    all_feat = np.concatenate([pos_feat, neg_feat0,
                               neg_feat1[neg_obj_mask == 1],
                               neg_feat1[neg_obj_mask == 0]], axis=0)
    sim = all_feat @ all_feat.T / temperature
    sim = sim - sim.max(axis=1, keepdims=True)
    lmp = (pos_labels == pos_labels.T).astype(np.float32)
    label_mask = np.zeros_like(sim)
    label_number = (lmp.shape[0] + 2 * label_mask_neg.shape[0]
                    if len(neg_mask) > 0 else lmp.shape[0])
    if len(neg_mask) > 0 and lmp.shape[0] > 0:
        sub = blkdiag([lmp, np.tile(label_mask_neg, (2, 2))])
    elif len(neg_mask) > 0:
        sub = np.tile(label_mask_neg, (2, 2))
    else:
        sub = lmp
    label_mask[:label_number, :label_number] = sub
    logits_mask = np.ones_like(sim)
    np.fill_diagonal(logits_mask, 0.0)
    exp_sim = np.exp(sim) * logits_mask
    log_prob = sim - np.log(exp_sim.sum(axis=1, keepdims=True))
    keep = label_mask.sum(1) > 0
    pllp = (log_prob * logits_mask * label_mask).sum(1)[keep] / label_mask.sum(1)[keep]
    ious = np.concatenate([ious_pos, ious_neg])
    keep2 = ious >= iou_threshold
    pllp = pllp[:keep2.shape[0]][keep2]
    loss = -pllp
    coef = np.ones_like(ious)[keep2]          # reweight_func = 'none'
    return (loss * coef).mean()


# --------------------------------- main --------------------------------------


if __name__ == "__main__":
    key = jax.random.PRNGKey(0)
    K = 32     # feature dim
    P = 8      # positive proposals
    N0 = 8     # neg_feat[0] proposals (== block-diag negative mask size)
    N1 = 10    # neg_feat[1] proposals
    k1, k2, k3, k4, k5, k6, k7 = jax.random.split(key, 7)

    def unit(x):
        return x / jnp.linalg.norm(x, axis=-1, keepdims=True)

    pos_feat = unit(jax.random.normal(k1, (P, K), jnp.float32))
    pos_labels = jax.random.randint(k2, (P,), 0, 3)
    ious_pos = jax.random.uniform(k3, (P,), jnp.float32)
    neg_feat0 = unit(jax.random.normal(k4, (N0, K), jnp.float32))
    neg_feat1 = unit(jax.random.normal(k5, (N1, K), jnp.float32))

    # per-image negative masks (block-diag pieces); sizes 3 + 5 == N0
    m1 = (jax.random.uniform(k6, (3, 3)) > 0.5).astype(jnp.float32)
    m2 = (jax.random.uniform(k7, (5, 5)) > 0.5).astype(jnp.float32)
    m1 = m1.at[jnp.arange(3), jnp.arange(3)].set(1.0)
    m2 = m2.at[jnp.arange(5), jnp.arange(5)].set(1.0)
    neg_mask = [m1, m2]
    neg_obj_mask = jnp.array([1, 0, 1, 1, 0, 1, 0, 1, 1, 0], jnp.int32)

    temperature = 0.2
    loss = mixcon_loss(pos_feat, pos_labels, ious_pos,
                       (neg_feat0, neg_feat1), (neg_mask, neg_obj_mask),
                       temperature=temperature, iou_threshold=0.5,
                       reweight_func='none')
    loss = jax.block_until_ready(loss)

    # The reference is fed the same sqrt(1/T)-scaled, bf16-rounded features the
    # kernel feeds the MXU, with temperature=1.0 (mathematically identical to
    # the original module), so the check isolates kernel correctness from the
    # declared bf16 precision choice.
    def fold(x):
        scaled = jnp.asarray(x, jnp.float32) * (1.0 / math.sqrt(temperature))
        return np.asarray(scaled.astype(jnp.bfloat16)).astype(np.float32)

    ref = _ref_loss_numpy(fold(pos_feat), pos_labels, ious_pos,
                          (fold(neg_feat0), fold(neg_feat1)),
                          ([np.asarray(m1), np.asarray(m2)],
                           np.asarray(neg_obj_mask)),
                          temperature=1.0, iou_threshold=0.5)

    assert np.isfinite(float(loss)), "loss is not finite"
    np.testing.assert_allclose(float(loss), float(ref), rtol=1e-2, atol=1e-2)
    print("KERNEL_OK")
</pallas_src>

<mosaic_0001>
module attributes {stable_mosaic.version = 11 : i64} {
  func.func @_mixcon_rowstats_kernel(%arg0: i32, %arg1: i32, %arg2: memref<128x128xbf16, #tpu.memory_space<vmem>>, %arg3: memref<128x128xi8, #tpu.memory_space<vmem>>, %arg4: memref<128x1xf32, #tpu.memory_space<vmem>>, %arg5: memref<128x1xf32, #tpu.memory_space<vmem>>, %arg6: memref<128x1xf32, #tpu.memory_space<vmem>>, %arg7: memref<128x1xf32, #tpu.memory_space<vmem>>, %arg8: memref<128x1xf32, #tpu.memory_space<vmem>>, %arg9: memref<128x1xf32, #tpu.memory_space<vmem>>) attributes {dimension_semantics = [#tpu.dimension_semantics<parallel>, #tpu.dimension_semantics<arbitrary>], iteration_bounds = array<i64: 1, 1>, scalar_prefetch = 0 : i64, scratch_operands = 3 : i64, tpu.core_type = #tpu.core_type<tc>, window_params = [{pipeline_mode = #tpu.pipeline_mode<synchronous>, transform_indices = @transform_0, window_bounds = array<i64: 128, 128>}, {transform_indices = @transform_1, window_bounds = array<i64: 128, 128>}, {transform_indices = @transform_2, window_bounds = array<i64: 128, 1>}, {transform_indices = @transform_3, window_bounds = array<i64: 128, 1>}, {transform_indices = @transform_4, window_bounds = array<i64: 128, 1>}]} {
    %c0_i32 = arith.constant 0 : i32
    %0 = arith.cmpi eq, %arg1, %c0_i32 : i32
    %1 = arith.extui %0 : i1 to i32
    %c0_i32_0 = arith.constant 0 : i32
    %2 = arith.cmpi ne, %1, %c0_i32_0 : i32
    scf.if %2 {
      %cst = arith.constant 0xFF800000 : f32
      %15 = vector.broadcast %cst : f32 to vector<128x1xf32>
      %c0 = arith.constant 0 : index
      %c0_6 = arith.constant 0 : index
      %16 = vector.load %arg7[%c0, %c0_6] : memref<128x1xf32, #tpu.memory_space<vmem>>, vector<128x1xf32>
      tpu.vector_store %arg7[%c0, %c0_6], %15 {strides = array<i32>} : memref<128x1xf32, #tpu.memory_space<vmem>>, vector<128x1xf32>,
      %cst_7 = arith.constant 0.000000e+00 : f32
      %17 = vector.broadcast %cst_7 : f32 to vector<128x1xf32>
      %c0_8 = arith.constant 0 : index
      %c0_9 = arith.constant 0 : index
      %18 = vector.load %arg8[%c0_8, %c0_9] : memref<128x1xf32, #tpu.memory_space<vmem>>, vector<128x1xf32>
      tpu.vector_store %arg8[%c0_8, %c0_9], %17 {strides = array<i32>} : memref<128x1xf32, #tpu.memory_space<vmem>>, vector<128x1xf32>,
      %cst_10 = arith.constant 0.000000e+00 : f32
      %19 = vector.broadcast %cst_10 : f32 to vector<128x1xf32>
      %c0_11 = arith.constant 0 : index
      %c0_12 = arith.constant 0 : index
      %20 = vector.load %arg9[%c0_11, %c0_12] : memref<128x1xf32, #tpu.memory_space<vmem>>, vector<128x1xf32>
      tpu.vector_store %arg9[%c0_11, %c0_12], %19 {strides = array<i32>} : memref<128x1xf32, #tpu.memory_space<vmem>>, vector<128x1xf32>,
    } else {
    }
    %c128_i32 = arith.constant 128 : i32
    %3 = arith.muli %arg0, %c128_i32 : i32
    %4 = tpu.assume_multiple %3, 128 : i32
    %c128_i32_1 = arith.constant 128 : i32
    %5 = arith.muli %arg1, %c128_i32_1 : i32
    %6 = tpu.assume_multiple %5, 128 : i32
    %c26_i32 = arith.constant 26 : i32
    %7 = arith.cmpi slt, %4, %c26_i32 : i32
    %c26_i32_2 = arith.constant 26 : i32
    %8 = arith.cmpi slt, %6, %c26_i32_2 : i32
    %9 = arith.andi %7, %8 : i1
    %10 = arith.extui %9 : i1 to i32
    %c0_i32_3 = arith.constant 0 : i32
    %11 = arith.cmpi ne, %10, %c0_i32_3 : i32
    scf.if %11 {
      %15 = arith.index_cast %4 : i32 to index
      %c0 = arith.constant 0 : index
      %16 = vector.load %arg2[%15, %c0] : memref<128x128xbf16, #tpu.memory_space<vmem>>, vector<128x128xbf16>
      %17 = arith.index_cast %6 : i32 to index
      %c0_6 = arith.constant 0 : index
      %18 = vector.load %arg2[%17, %c0_6] : memref<128x128xbf16, #tpu.memory_space<vmem>>, vector<128x128xbf16>
      %cst = arith.constant dense<0.000000e+00> : vector<128x128xf32>
      %19 = tpu.matmul %16, %18, %cst {dimension_numbers = #tpu.dot_dimension_numbers<[1], [1], [0], [0], [0, 0, 1, 0], [], []>} : vector<128x128xbf16>, vector<128x128xbf16>, vector<128x128xf32> -> vector<128x128xf32>
      %c0_7 = arith.constant 0 : index
      %c0_8 = arith.constant 0 : index
      %20 = vector.load %arg7[%c0_7, %c0_8] : memref<128x1xf32, #tpu.memory_space<vmem>>, vector<128x1xf32>
      %cst_9 = arith.constant dense<0xFF800000> : vector<128xf32>
      %21 = vector.multi_reduction <maximumf>, %19, %cst_9 [1] : vector<128x128xf32> to vector<128xf32>
      %22 = vector.shape_cast %21 : vector<128xf32> to vector<128x1xf32>
      %23 = arith.maximumf %20, %22 : vector<128x1xf32>
      %24 = arith.subf %20, %23 : vector<128x1xf32>
      %25 = math.exp %24 : vector<128x1xf32>
      %26 = tpu.iota {dimensions = array<i32: 1>} : vector<1x128xi32>
      %27 = vector.broadcast %6 : i32 to vector<1x128xi32>
      %28 = arith.addi %27, %26 : vector<1x128xi32>
      %c26_i32_10 = arith.constant 26 : i32
      %29 = vector.broadcast %c26_i32_10 : i32 to vector<1x128xi32>
      %30 = arith.cmpi slt, %28, %29 : vector<1x128xi32>
      %31 = vector.broadcast %23 : vector<128x1xf32> to vector<128x128xf32>
      %32 = arith.subf %19, %31 : vector<128x128xf32>
      %33 = math.exp %32 : vector<128x128xf32>
      %cst_11 = arith.constant 0.000000e+00 : f32
      %34 = vector.shape_cast %30 : vector<1x128xi1> to vector<1x128xi1>
      %35 = vector.broadcast %34 : vector<1x128xi1> to vector<128x128xi1>
      %36 = vector.broadcast %cst_11 : f32 to vector<128x128xf32>
      %37 = arith.select %35, %33, %36 : vector<128x128xi1>, vector<128x128xf32>
      %c0_12 = arith.constant 0 : index
      %c0_13 = arith.constant 0 : index
      %38 = vector.load %arg3[%c0_12, %c0_13] : memref<128x128xi8, #tpu.memory_space<vmem>>, vector<128x128xi8>
      %39 = arith.sitofp %38 : vector<128x128xi8> to vector<128x128xf32>
      %c0_14 = arith.constant 0 : index
      %c0_15 = arith.constant 0 : index
      %40 = vector.load %arg8[%c0_14, %c0_15] : memref<128x1xf32, #tpu.memory_space<vmem>>, vector<128x1xf32>
      %41 = arith.mulf %40, %25 : vector<128x1xf32>
      %cst_16 = arith.constant dense<0.000000e+00> : vector<128xf32>
      %42 = vector.multi_reduction <add>, %37, %cst_16 [1] : vector<128x128xf32> to vector<128xf32>
      %43 = vector.shape_cast %42 : vector<128xf32> to vector<128x1xf32>
      %44 = arith.addf %41, %43 : vector<128x1xf32>
      %c0_17 = arith.constant 0 : index
      %c0_18 = arith.constant 0 : index
      %45 = vector.load %arg8[%c0_17, %c0_18] : memref<128x1xf32, #tpu.memory_space<vmem>>, vector<128x1xf32>
      tpu.vector_store %arg8[%c0_17, %c0_18], %44 {strides = array<i32>} : memref<128x1xf32, #tpu.memory_space<vmem>>, vector<128x1xf32>,
      %c0_19 = arith.constant 0 : index
      %c0_20 = arith.constant 0 : index
      %46 = vector.load %arg9[%c0_19, %c0_20] : memref<128x1xf32, #tpu.memory_space<vmem>>, vector<128x1xf32>
      %47 = arith.mulf %19, %39 : vector<128x128xf32>
      %cst_21 = arith.constant dense<0.000000e+00> : vector<128xf32>
      %48 = vector.multi_reduction <add>, %47, %cst_21 [1] : vector<128x128xf32> to vector<128xf32>
      %49 = vector.shape_cast %48 : vector<128xf32> to vector<128x1xf32>
      %50 = arith.addf %46, %49 : vector<128x1xf32>
      %c0_22 = arith.constant 0 : index
      %c0_23 = arith.constant 0 : index
      %51 = vector.load %arg9[%c0_22, %c0_23] : memref<128x1xf32, #tpu.memory_space<vmem>>, vector<128x1xf32>
      tpu.vector_store %arg9[%c0_22, %c0_23], %50 {strides = array<i32>} : memref<128x1xf32, #tpu.memory_space<vmem>>, vector<128x1xf32>,
      %c0_24 = arith.constant 0 : index
      %c0_25 = arith.constant 0 : index
      %52 = vector.load %arg7[%c0_24, %c0_25] : memref<128x1xf32, #tpu.memory_space<vmem>>, vector<128x1xf32>
      tpu.vector_store %arg7[%c0_24, %c0_25], %23 {strides = array<i32>} : memref<128x1xf32, #tpu.memory_space<vmem>>, vector<128x1xf32>,
    } else {
    }
    %c0_i32_4 = arith.constant 0 : i32
    %12 = arith.cmpi eq, %arg1, %c0_i32_4 : i32
    %13 = arith.extui %12 : i1 to i32
    %c0_i32_5 = arith.constant 0 : i32
    %14 = arith.cmpi ne, %13, %c0_i32_5 : i32
    scf.if %14 {
      %c0 = arith.constant 0 : index
      %c0_6 = arith.constant 0 : index
      %15 = vector.load %arg7[%c0, %c0_6] : memref<128x1xf32, #tpu.memory_space<vmem>>, vector<128x1xf32>
      %c0_7 = arith.constant 0 : index
      %c0_8 = arith.constant 0 : index
      %16 = vector.load %arg4[%c0_7, %c0_8] : memref<128x1xf32, #tpu.memory_space<vmem>>, vector<128x1xf32>
      tpu.vector_store %arg4[%c0_7, %c0_8], %15 {strides = array<i32>} : memref<128x1xf32, #tpu.memory_space<vmem>>, vector<128x1xf32>,
      %c0_9 = arith.constant 0 : index
      %c0_10 = arith.constant 0 : index
      %17 = vector.load %arg8[%c0_9, %c0_10] : memref<128x1xf32, #tpu.memory_space<vmem>>, vector<128x1xf32>
      %c0_11 = arith.constant 0 : index
      %c0_12 = arith.constant 0 : index
      %18 = vector.load %arg5[%c0_11, %c0_12] : memref<128x1xf32, #tpu.memory_space<vmem>>, vector<128x1xf32>
      tpu.vector_store %arg5[%c0_11, %c0_12], %17 {strides = array<i32>} : memref<128x1xf32, #tpu.memory_space<vmem>>, vector<128x1xf32>,
      %c0_13 = arith.constant 0 : index
      %c0_14 = arith.constant 0 : index
      %19 = vector.load %arg9[%c0_13, %c0_14] : memref<128x1xf32, #tpu.memory_space<vmem>>, vector<128x1xf32>
      %c0_15 = arith.constant 0 : index
      %c0_16 = arith.constant 0 : index
      %20 = vector.load %arg6[%c0_15, %c0_16] : memref<128x1xf32, #tpu.memory_space<vmem>>, vector<128x1xf32>
      tpu.vector_store %arg6[%c0_15, %c0_16], %19 {strides = array<i32>} : memref<128x1xf32, #tpu.memory_space<vmem>>, vector<128x1xf32>,
    } else {
    }
    return
  }
  func.func @transform_0(%arg0: i32, %arg1: i32) -> (i32, i32) {
    %c0_i32 = arith.constant 0 : i32
    %c0_i32_0 = arith.constant 0 : i32
    %c0_i32_1 = arith.constant 0 : i32
    return %c0_i32, %c0_i32_0 : i32, i32
  }
  func.func @transform_1(%arg0: i32, %arg1: i32) -> (i32, i32) {
    %c0_i32 = arith.constant 0 : i32
    return %arg0, %arg1 : i32, i32
  }
  func.func @transform_2(%arg0: i32, %arg1: i32) -> (i32, i32) {
    %c0_i32 = arith.constant 0 : i32
    %c0_i32_0 = arith.constant 0 : i32
    return %arg0, %c0_i32 : i32, i32
  }
  func.func @transform_3(%arg0: i32, %arg1: i32) -> (i32, i32) {
    %c0_i32 = arith.constant 0 : i32
    %c0_i32_0 = arith.constant 0 : i32
    return %arg0, %c0_i32 : i32, i32
  }
  func.func @transform_4(%arg0: i32, %arg1: i32) -> (i32, i32) {
    %c0_i32 = arith.constant 0 : i32
    %c0_i32_0 = arith.constant 0 : i32
    return %arg0, %c0_i32 : i32, i32
  }
}

</mosaic_0001>

<bundles_post_ra>
// kernel: tpu_custom_call.1
= control target key start
LH: loop header
LB: loop body
LE: loop exit
PB: predicated region body
PF: predicated region fallthrough
CT: control target
= control target key end

     0   :  { %10 = vsyncpa [#allocation6], 0  ;;  %s1809_s0 = inlined_call_operand.hbm [shape: bf16[128,128], index: 0, kind: input, shape index: {}]   ;;  %s1810_s1 = inlined_call_operand.hbm [shape: s8[128,128], index: 1, kind: input, shape index: {}]   ;;  %s1811_s2 = inlined_call_operand.vmem [shape: f32[128,1], index: 2, kind: output, shape index: {0}]   ;;  %s1812_s3 = inlined_call_operand.vmem [shape: f32[128,1], index: 3, kind: output, shape index: {1}]   ;;  %s1813_s4 = inlined_call_operand.vmem [shape: f32[128,1], index: 4, kind: output, shape index: {2}]  }
   0x1   :  { %s16_s17 = sshll.u32 %s1809_s0, 4  ;;  %s17_s17 = int_to_ptr.hbm [resolvable:$true] %s16_s17 }
   0x2   :  { %11 = vsyncpa [#allocation8], 0  ;;  %s1150_s18 = smov [#allocation5]   ;;  %s29_s22 = sshll.u32 %s1810_s1, 4  ;;  %s30_s22 = int_to_ptr.hbm [resolvable:$true] %s29_s22 }
   0x3   :  { %s18_s19 = sshll.u32 %s1150_s18, 4  ;;  %s1151_s23 = smov 64   ;;  %s19_s19 = int_to_ptr.vmem [resolvable:$true] %s18_s19 }
   0x4   :  { %s1152_s24 = smov 4   ;;  %s1153_s25 = smov [#allocation7]  }
   0x5   :  { %24 = dma.hbm_to_vmem [thread:$0]  %s17_s17, 1024, %s19_s19, [#allocation6], %s1151_s23, %s1151_s23, %s1152_s24  }
   0x6   :  { %s31_s26 = sshll.u32 %s1153_s25, 4  ;;  %s1154_s27 = smov 128   ;;  %s32_s26 = int_to_ptr.vmem [resolvable:$true] %s31_s26 }
   0x7   :  { %s1155_s28 = smov 8  }
   0x8   :  { %37 = dma.hbm_to_vmem [thread:$0]  %s30_s22, 512, %s32_s26, [#allocation8], %s1154_s27, %s1154_s27, %s1155_s28  }
   0x9   :  { %1146 = dma.done.wait [#allocation6], 1024  }
   0xa   :  { %1147 = vsyncadd [#allocation6], 4294966272 }
   0xb   :  { %1148 = dma.done.wait [#allocation8], 512  }
   0xc   :  { %1149 = vsyncadd [#allocation8], 4294966784  ;;  %v997_v0 = vld [vmem:[#allocation5 + $0x38] sm:$0xff]  ;;  %v996_v1 = vld [vmem:[#allocation5 + $0x30] sm:$0xff]  ;;  %vm50_vm0 = vcmask 7168   ;;  %v1156_v58 = vmov -inf  }
   0xd   :  { %243 = vmatpush.bf16.xpose.msra.mxu0 %v997_v0  ;;  %998 = vmatpush.bf16.xpose.msra.mxu1 %v997_v0  ;;  %v995_v2 = vld [vmem:[#allocation5 + $0x28] sm:$0xff]  ;;  %v994_v3 = vld [vmem:[#allocation5 + $0x20] sm:$0xff]  ;;  %v993_v4 = vld [vmem:[#allocation5 + $0x18] sm:$0xff]  ;;  %55 = vst.msk [vmem:[#allocation2 + $0x20] sm:$0xff] %vm50_vm0, %v1156_v58 }
   0xe   :  { %1000 = vmatpush.bf16.xpose.msra.mxu3 %v997_v0  ;;  %999 = vmatpush.bf16.xpose.msra.mxu2 %v997_v0  ;;  %v992_v5 = vld [vmem:[#allocation5 + $0x10] sm:$0xff]  ;;  %v991_v6 = vld [vmem:[#allocation5 + $0x8] sm:$0xff]  ;;  %v990_v7 = vld [vmem:[#allocation5] sm:$0xff]  ;;  %51 = vst.msk [vmem:[#allocation2] sm:$0xff] %vm50_vm0, %v1156_v58 }
   0xf   :  { %v982_v8 = vld [vmem:[#allocation5] sm:$0xff]  ;;  %v984_v9 = vld [vmem:[#allocation5 + $0x10] sm:$0xff]  ;;  %v983_v12 = vld [vmem:[#allocation5 + $0x8] sm:$0xff]  ;;  %52 = vst.msk [vmem:[#allocation2 + $0x8] sm:$0xff] %vm50_vm0, %v1156_v58 }
  0x10   :  { %v988_v10 = vld [vmem:[#allocation5 + $0x30] sm:$0xff]  ;;  %v986_v11 = vld [vmem:[#allocation5 + $0x20] sm:$0xff]  ;;  %v985_v13 = vld [vmem:[#allocation5 + $0x18] sm:$0xff]  ;;  %53 = vst.msk [vmem:[#allocation2 + $0x10] sm:$0xff] %vm50_vm0, %v1156_v58 }
  0x11   :  { %v989_v14 = vld [vmem:[#allocation5 + $0x38] sm:$0xff]  ;;  %v987_v15 = vld [vmem:[#allocation5 + $0x28] sm:$0xff]  ;;  %v1190_v16 = vld [vmem:[#allocation7] sm:$0xff]  ;;  %54 = vst.msk [vmem:[#allocation2 + $0x18] sm:$0xff] %vm50_vm0, %v1156_v58 }
  0x12   :  { %v559_v17 = vunpack.c.0.s8 %v1190_v16  ;;  %v1193_v18 = vld [vmem:[#allocation7 + $0x8] sm:$0xff]  ;;  %v1196_v21 = vld [vmem:[#allocation7 + $0x18] sm:$0xff]  ;;  %v1211_v31 = vld [vmem:[#allocation7 + $0x10] sm:$0xff]  ;;  %v560_v39 = vunpack.c.1.s8 %v1190_v16  ;;  %v561_v60 = vunpack.c.2.s8 %v1190_v16  ;;  %56 = vst.msk [vmem:[#allocation2 + $0x28] sm:$0xff] %vm50_vm0, %v1156_v58 }
  0x13   :  { %v563_v20 = vunpack.c.0.s8 %v1193_v18  ;;  %v571_v24 = vunpack.c.0.s8 %v1196_v21  ;;  %v567_v32 = vunpack.c.0.s8 %v1211_v31  ;;  %v564_v38 = vunpack.c.1.s8 %v1193_v18  ;;  %57 = vst.msk [vmem:[#allocation2 + $0x30] sm:$0xff] %vm50_vm0, %v1156_v58 }
  0x14   :  { %v575_v19 = vcvt.s32.f32 %v559_v17  ;;  %v568_v42 = vunpack.c.1.s8 %v1211_v31  ;;  %v576_v44 = vcvt.s32.f32 %v560_v39  ;;  %v565_v49 = vunpack.c.2.s8 %v1193_v18  ;;  %58 = vst.msk [vmem:[#allocation2 + $0x38] sm:$0xff] %vm50_vm0, %v1156_v58 }
  0x15   :  { %244 = vmatpush.bf16.xpose.msra.mxu0 %v996_v1  ;;  %1001 = vmatpush.bf16.xpose.msra.mxu1 %v996_v1  ;;  %v579_v26 = vcvt.s32.f32 %v563_v20  ;;  %v587_v27 = vcvt.s32.f32 %v571_v24  ;;  %v583_v35 = vcvt.s32.f32 %v567_v32  ;;  %v580_v43 = vcvt.s32.f32 %v564_v38  ;;  %59 = vst.msk [vmem:[#allocation2 + $0x40] sm:$0xff] %vm50_vm0, %v1156_v58 }
  0x16   :  { %1003 = vmatpush.bf16.xpose.msra.mxu3 %v996_v1  ;;  %1002 = vmatpush.bf16.xpose.msra.mxu2 %v996_v1  ;;  %v584_v45 = vcvt.s32.f32 %v568_v42  ;;  %v581_v51 = vcvt.s32.f32 %v565_v49  ;;  %v569_v53 = vunpack.c.2.s8 %v1211_v31  ;;  %v566_v61 = vunpack.c.3.s8 %v1193_v18  ;;  %60 = vst.msk [vmem:[#allocation2 + $0x48] sm:$0xff] %vm50_vm0, %v1156_v58  ;;  %v1364_v49 = vld [vmem:[#allocation2 + $0x8] sm:$0xff] }
  0x17   :  { %v577_v62 = vcvt.s32.f32 %v561_v60  ;;  %61 = vst.msk [vmem:[#allocation2 + $0x50] sm:$0xff] %vm50_vm0, %v1156_v58 }
  0x18   :  { %v585_v56 = vcvt.s32.f32 %v569_v53  ;;  %v582_v63 = vcvt.s32.f32 %v566_v61  ;;  %62 = vst.msk [vmem:[#allocation2 + $0x58] sm:$0xff] %vm50_vm0, %v1156_v58 }
  0x19   :  { %63 = vst.msk [vmem:[#allocation2 + $0x60] sm:$0xff] %vm50_vm0, %v1156_v58 }
  0x1a   :  { %64 = vst.msk [vmem:[#allocation2 + $0x68] sm:$0xff] %vm50_vm0, %v1156_v58 }
  0x1b   :  { %65 = vst.msk [vmem:[#allocation2 + $0x70] sm:$0xff] %vm50_vm0, %v1156_v58 }
  0x1c   :  { %66 = vst.msk [vmem:[#allocation2 + $0x78] sm:$0xff] %vm50_vm0, %v1156_v58 }
  0x1d   :  { %245 = vmatpush.bf16.xpose.msra.mxu0 %v995_v2  ;;  %1004 = vmatpush.bf16.xpose.msra.mxu1 %v995_v2 }
  0x1e   :  { %1006 = vmatpush.bf16.xpose.msra.mxu3 %v995_v2  ;;  %1005 = vmatpush.bf16.xpose.msra.mxu2 %v995_v2 }
  0x21   :  { %v1369_v53 = vld [vmem:[#allocation2 + $0x68] sm:$0xff] }
  0x25   :  { %246 = vmatpush.bf16.xpose.msra.mxu0 %v994_v3  ;;  %1007 = vmatpush.bf16.xpose.msra.mxu1 %v994_v3 }
  0x26   :  { %1009 = vmatpush.bf16.xpose.msra.mxu3 %v994_v3  ;;  %1008 = vmatpush.bf16.xpose.msra.mxu2 %v994_v3 }
  0x2d   :  { %247 = vmatpush.bf16.xpose.msra.mxu0 %v993_v4  ;;  %1010 = vmatpush.bf16.xpose.msra.mxu1 %v993_v4 }
  0x2e   :  { %1012 = vmatpush.bf16.xpose.msra.mxu3 %v993_v4  ;;  %1011 = vmatpush.bf16.xpose.msra.mxu2 %v993_v4  ;;  %v570_v4 = vunpack.c.3.s8 %v1211_v31 }
  0x35   :  { %248 = vmatpush.bf16.xpose.msra.mxu0 %v992_v5  ;;  %1013 = vmatpush.bf16.xpose.msra.mxu1 %v992_v5 }
  0x36   :  { %1015 = vmatpush.bf16.xpose.msra.mxu3 %v992_v5  ;;  %1014 = vmatpush.bf16.xpose.msra.mxu2 %v992_v5 }
  0x3d   :  { %249 = vmatpush.bf16.xpose.msra.mxu0 %v991_v6  ;;  %1016 = vmatpush.bf16.xpose.msra.mxu1 %v991_v6 }
  0x3e   :  { %1018 = vmatpush.bf16.xpose.msra.mxu3 %v991_v6  ;;  %1017 = vmatpush.bf16.xpose.msra.mxu2 %v991_v6 }
  0x45   :  { %250 = vmatpush.bf16.xpose.msra.mxu0 %v990_v7  ;;  %1019 = vmatpush.bf16.xpose.msra.mxu1 %v990_v7 }
  0x46   :  { %1021 = vmatpush.bf16.xpose.msra.mxu3 %v990_v7  ;;  %1020 = vmatpush.bf16.xpose.msra.mxu2 %v990_v7  ;;  %v562_v7 = vunpack.c.3.s8 %v1190_v16 }
  0x4c   :  { %251 = vmatmul.bf16.vlgmr.msra.gmra.mxu0 %v982_v8  ;;  %261 = vmatmul.bf16.vlgmr.msra.gmra.mxu1 %v984_v9  ;;  %v586_v8 = vcvt.s32.f32 %v570_v4  ;;  %v578_v9 = vcvt.s32.f32 %v562_v7 }
  0x4d   :  { %281 = vmatmul.bf16.vlgmr.msra.gmra.mxu3 %v988_v10  ;;  %271 = vmatmul.bf16.vlgmr.msra.gmra.mxu2 %v986_v11 }
  0x5c   :  { %256 = vmatmul.bf16.gmra.mxu0 %v983_v12  ;;  %266 = vmatmul.bf16.gmra.mxu1 %v985_v13  ;;  %v1157_v12 = vmov 0.0   ;;  %v1158_v13 = vmov 0  }
  0x5d   :  { %286 = vmatmul.bf16.gmra.mxu3 %v989_v14  ;;  %276 = vmatmul.bf16.gmra.mxu2 %v987_v15  ;;  %83 = vst.msk [vmem:[#allocation4] sm:$0xff] %vm50_vm0, %v1157_v12  ;;  %v1320_v14 = vld [vmem:[#allocation2 + $0x20] sm:$0xff] }
  0x5e   :  { %67 = vst.msk [vmem:[#allocation3] sm:$0xff] %vm50_vm0, %v1157_v12  ;;  %1031 = vset.pattern.permute.xlu1 %v1158_v13  ;;  %1032 = vset.pattern.permute.xlu0 %v1158_v13  ;;  %v1322_v15 = vld [vmem:[#allocation2] sm:$0xff] }
  0x5f   :  { %68 = vst.msk [vmem:[#allocation3 + $0x8] sm:$0xff] %vm50_vm0, %v1157_v12  ;;  %1033 = vset.pattern.permute.xlu2 %v1158_v13 }
  0x60   :  { %69 = vst.msk [vmem:[#allocation3 + $0x10] sm:$0xff] %vm50_vm0, %v1157_v12 }
  0x61   :  { %70 = vst.msk [vmem:[#allocation3 + $0x18] sm:$0xff] %vm50_vm0, %v1157_v12 }
  0x62   :  { %71 = vst.msk [vmem:[#allocation3 + $0x20] sm:$0xff] %vm50_vm0, %v1157_v12 }
  0x63   :  { %72 = vst.msk [vmem:[#allocation3 + $0x28] sm:$0xff] %vm50_vm0, %v1157_v12 }
  0x64   :  { %73 = vst.msk [vmem:[#allocation3 + $0x30] sm:$0xff] %vm50_vm0, %v1157_v12  ;;  %v688_v18 = vld [vmem:[#allocation4] sm:$0xff] }
  0x65   :  { %74 = vst.msk [vmem:[#allocation3 + $0x38] sm:$0xff] %vm50_vm0, %v1157_v12 }
  0x66   :  { %75 = vst.msk [vmem:[#allocation3 + $0x40] sm:$0xff] %vm50_vm0, %v1157_v12 }
  0x67   :  { %76 = vst.msk [vmem:[#allocation3 + $0x48] sm:$0xff] %vm50_vm0, %v1157_v12 }
  0x68   :  { %77 = vst.msk [vmem:[#allocation3 + $0x50] sm:$0xff] %vm50_vm0, %v1157_v12 }
  0x69   :  { %78 = vst.msk [vmem:[#allocation3 + $0x58] sm:$0xff] %vm50_vm0, %v1157_v12 }
  0x6a   :  { %79 = vst.msk [vmem:[#allocation3 + $0x60] sm:$0xff] %vm50_vm0, %v1157_v12 }
  0x6b   :  { %80 = vst.msk [vmem:[#allocation3 + $0x68] sm:$0xff] %vm50_vm0, %v1157_v12 }
  0x6c   :  { %81 = vst.msk [vmem:[#allocation3 + $0x70] sm:$0xff] %vm50_vm0, %v1157_v12 }
  0x6d   :  { %82 = vst.msk [vmem:[#allocation3 + $0x78] sm:$0xff] %vm50_vm0, %v1157_v12 }
  0x6e   :  { %84 = vst.msk [vmem:[#allocation4 + $0x8] sm:$0xff] %vm50_vm0, %v1157_v12 }
  0x6f   :  { %85 = vst.msk [vmem:[#allocation4 + $0x10] sm:$0xff] %vm50_vm0, %v1157_v12 }
  0x70   :  { %86 = vst.msk [vmem:[#allocation4 + $0x18] sm:$0xff] %vm50_vm0, %v1157_v12 }
  0x71   :  { %87 = vst.msk [vmem:[#allocation4 + $0x20] sm:$0xff] %vm50_vm0, %v1157_v12 }
  0x72   :  { %88 = vst.msk [vmem:[#allocation4 + $0x28] sm:$0xff] %vm50_vm0, %v1157_v12 }
  0x73   :  { %89 = vst.msk [vmem:[#allocation4 + $0x30] sm:$0xff] %vm50_vm0, %v1157_v12 }
  0x74   :  { %90 = vst.msk [vmem:[#allocation4 + $0x38] sm:$0xff] %vm50_vm0, %v1157_v12 }
  0x75   :  { %91 = vst.msk [vmem:[#allocation4 + $0x40] sm:$0xff] %vm50_vm0, %v1157_v12 }
  0x76   :  { %92 = vst.msk [vmem:[#allocation4 + $0x48] sm:$0xff] %vm50_vm0, %v1157_v12 }
  0x77   :  { %93 = vst.msk [vmem:[#allocation4 + $0x50] sm:$0xff] %vm50_vm0, %v1157_v12 }
  0x78   :  { %94 = vst.msk [vmem:[#allocation4 + $0x58] sm:$0xff] %vm50_vm0, %v1157_v12 }
  0x79   :  { %95 = vst.msk [vmem:[#allocation4 + $0x60] sm:$0xff] %vm50_vm0, %v1157_v12 }
  0x7a   :  { %96 = vst.msk [vmem:[#allocation4 + $0x68] sm:$0xff] %vm50_vm0, %v1157_v12 }
  0x7b   :  { %97 = vst.msk [vmem:[#allocation4 + $0x70] sm:$0xff] %vm50_vm0, %v1157_v12 }
  0x7c   :  { %98 = vst.msk [vmem:[#allocation4 + $0x78] sm:$0xff] %vm50_vm0, %v1157_v12 }
  0xc9   :  { %v1198_v22 = vpop.f32.mrf.mxu0  ;;  %v1200_v23 = vpop.f32.mrf.mxu1 }
  0xca   :  { %316 = vmax.xlane.f32.xlu2 %v1200_v23  ;;  %308 = vmax.xlane.f32.xlu0 %v1198_v22  ;;  %v704_v25 = vmul.f32 %v575_v19, %v1198_v22  ;;  %v708_v28 = vmul.f32 %v579_v26, %v1200_v23 }
  0xcc   :  { %720 = vadd.xlane.f32.xlu1 %v704_v25 }
  0xd0   :  { %v1207_v29 = vpop.f32.mrf.mxu3  ;;  %v1216_v34 = vpop.f32.mrf.mxu2 }
  0xd1   :  { %v716_v30 = vmul.f32 %v587_v27, %v1207_v29  ;;  %v1214_v33 = vpop.f32.mrf.mxu0  ;;  %v712_v37 = vmul.f32 %v583_v35, %v1216_v34  ;;  %v1226_v40 = vpop.f32.mrf.mxu1 }
  0xd2   :  { %728 = vadd.xlane.f32.xlu2 %v708_v28  ;;  %332 = vmax.xlane.f32.xlu0 %v1207_v29  ;;  %v709_v47 = vmul.f32 %v580_v43, %v1226_v40  ;;  %v705_v48 = vmul.f32 %v576_v44, %v1214_v33  ;;  %v1340_v28 = vld [vmem:[#allocation2 + $0x60] sm:$0xff] }
  0xd4   :  { %744 = vadd.xlane.f32.xlu1 %v716_v30  ;;  %v692_v30 = vld [vmem:[#allocation4 + $0x20] sm:$0xff] }
  0xd8   :  { %v1220_v36 = vpop.f32.mrf.mxu3  ;;  %v1233_v46 = vpop.f32.mrf.mxu2 }
  0xd9   :  { %v1228_v41 = vpop.f32.mrf.mxu0  ;;  %v713_v50 = vmul.f32 %v584_v45, %v1233_v46  ;;  %v1239_v52 = vpop.f32.mrf.mxu1 }
  0xda   :  { %324 = vmax.xlane.f32.xlu2 %v1216_v34  ;;  %310 = vmax.xlane.f32.xlu0 %v1214_v33  ;;  %v710_v55 = vmul.f32 %v581_v51, %v1239_v52  ;;  %v706_v1 = vmul.f32 %v577_v62, %v1228_v41 }
  0xdc   :  { %334 = vmax.xlane.f32.xlu1 %v1220_v36 }
  0xe0   :  { %v1242_v54 = vpop.f32.mrf.mxu3  ;;  %v1247_v57 = vpop.f32.mrf.mxu2 }
  0xe1   :  { %v714_v59 = vmul.f32 %v585_v56, %v1247_v57  ;;  %v1262_v0 = vpop.f32.mrf.mxu1  ;;  %v1272_v3 = vpop.f32.mrf.mxu0 }
  0xe2   :  { %318 = vmax.xlane.f32.xlu2 %v1226_v40  ;;  %736 = vadd.xlane.f32.xlu0 %v712_v37  ;;  %v711_v2 = vmul.f32 %v582_v63, %v1262_v0  ;;  %v707_v11 = vmul.f32 %v578_v9, %v1272_v3  ;;  %v700_v37 = vld [vmem:[#allocation4 + $0x60] sm:$0xff] }
  0xe3   :  { %v696_v9 = vld [vmem:[#allocation4 + $0x40] sm:$0xff] }
  0xe4   :  { %312 = vmax.xlane.f32.xlu1 %v1228_v41 }
  0xe8   :  { %v1278_v5 = vpop.f32.mrf.mxu3  ;;  %v1280_v6 = vpop.f32.mrf.mxu2 }
  0xe9   :  { %v715_v10 = vmul.f32 %v586_v8, %v1280_v6 }
  0xea   :  { %730 = vadd.xlane.f32.xlu0 %v709_v47  ;;  %722 = vadd.xlane.f32.xlu2 %v705_v48  ;;  %v1362_v48 = vld [vmem:[#allocation2 + $0x40] sm:$0xff] }
  0xec   :  { %738 = vadd.xlane.f32.xlu1 %v713_v50 }
  0xf2   :  { %326 = vmax.xlane.f32.xlu0 %v1233_v46  ;;  %336 = vmax.xlane.f32.xlu2 %v1242_v54 }
  0xf4   :  { %732 = vadd.xlane.f32.xlu1 %v710_v55 }
  0xfa   :  { %320 = vmax.xlane.f32.xlu0 %v1239_v52  ;;  %740 = vadd.xlane.f32.xlu2 %v714_v59 }
  0xfc   :  { %328 = vmax.xlane.f32.xlu1 %v1247_v57 }
 0x102   :  { %734 = vadd.xlane.f32.xlu2 %v711_v2  ;;  %724 = vadd.xlane.f32.xlu0 %v706_v1  ;;  %v1398_v2 = vld [vmem:[#allocation2 + $0x28] sm:$0xff] }
 0x104   :  { %314 = vmax.xlane.f32.xlu1 %v1272_v3 }
 0x10a   :  { %330 = vmax.xlane.f32.xlu2 %v1280_v6  ;;  %338 = vmax.xlane.f32.xlu0 %v1278_v5 }
 0x10c   :  { %322 = vmax.xlane.f32.xlu1 %v1262_v0 }
 0x112   :  { %742 = vadd.xlane.f32.xlu0 %v715_v10  ;;  %v1408_v10 = vld [vmem:[#allocation2 + $0x10] sm:$0xff] }
 0x114   :  { %726 = vadd.xlane.f32.xlu1 %v707_v11 }
 0x13d   :  { %v317_v16 = vpop.xlane.xlu2 %316  ;;  %v309_v17 = vpop.xlane.xlu0 %308 }
 0x13e   :  { %v1325_v19 = vmax.f32 %v1320_v14, %v317_v16  ;;  %v1328_v20 = vmax.f32 %v1322_v15, %v309_v17 }
 0x13f   :  { %v721_v24 = vpop.xlane.xlu1 %720 }
 0x140   :  { %788 = vst.msk [vmem:[#allocation2 + $0x20] sm:$0xff] %vm50_vm0, %v1325_v19  ;;  %v752_v27 = vadd.f32 %v721_v24, %v688_v18  ;;  %411 = vperm.xlu1 %1031, %v1328_v20  }
 0x141   :  { %784 = vst.msk [vmem:[#allocation2] sm:$0xff] %vm50_vm0, %v1328_v20 }
 0x142   :  { %768 = vst.msk [vmem:[#allocation4] sm:$0xff] %vm50_vm0, %v752_v27 }
 0x145   :  { %v729_v31 = vpop.xlane.xlu2 %728  ;;  %v333_v32 = vpop.xlane.xlu0 %332 }
 0x146   :  { %v1343_v35 = vmax.f32 %v1340_v28, %v333_v32  ;;  %v756_v39 = vadd.f32 %v729_v31, %v692_v30  ;;  %v693_v31 = vld [vmem:[#allocation4 + $0x28] sm:$0xff] }
 0x147   :  { %v807_v38 = vld [vmem:[#allocation2 + $0x20] sm:$0xff]  ;;  %v745_v42 = vpop.xlane.xlu1 %744  ;;  %v689_v32 = vld [vmem:[#allocation4 + $0x8] sm:$0xff] }
 0x148   :  { %824 = vst.msk [vmem:[%s1811_s2 + $0x20] sm:$0xff] %vm50_vm0, %v807_v38  ;;  %v803_v43 = vld [vmem:[#allocation2] sm:$0xff]  ;;  %471 = vperm.xlu0 %1032, %v1343_v35   ;;  %431 = vperm.xlu1 %1031, %v1325_v19   ;;  %v764_v47 = vadd.f32 %v745_v42, %v700_v37 }
 0x149   :  { %820 = vst.msk [vmem:[%s1811_s2] sm:$0xff] %vm50_vm0, %v803_v43  ;;  %v868_v45 = vld [vmem:[#allocation4] sm:$0xff] }
 0x14a   :  { %884 = vst.msk [vmem:[%s1813_s4] sm:$0xff] %vm50_vm0, %v868_v45 }
 0x14b   :  { %772 = vst.msk [vmem:[#allocation4 + $0x20] sm:$0xff] %vm50_vm0, %v756_v39  ;;  %v697_v39 = vld [vmem:[#allocation4 + $0x48] sm:$0xff] }
 0x14c   :  { %796 = vst.msk [vmem:[#allocation2 + $0x60] sm:$0xff] %vm50_vm0, %v1343_v35 }
 0x14d   :  { %780 = vst.msk [vmem:[#allocation4 + $0x60] sm:$0xff] %vm50_vm0, %v764_v47  ;;  %v325_v50 = vpop.xlane.xlu2 %324  ;;  %v311_v51 = vpop.xlane.xlu0 %310 }
 0x14e   :  { %v1372_v55 = vmax.f32 %v1362_v48, %v325_v50  ;;  %v1375_v56 = vmax.f32 %v1364_v49, %v311_v51 }
 0x14f   :  { %v335_v58 = vpop.xlane.xlu1 %334 }
 0x150   :  { %792 = vst.msk [vmem:[#allocation2 + $0x40] sm:$0xff] %vm50_vm0, %v1372_v55  ;;  %v1384_v61 = vmax.f32 %v1369_v53, %v335_v58  ;;  %416 = vperm.xlu2 %1033, %v1375_v56   ;;  %451 = vperm.xlu1 %1031, %v1372_v55   ;;  %v1446_v58 = vld [vmem:[#allocation2 + $0x48] sm:$0xff] }
 0x151   :  { %785 = vst.msk [vmem:[#allocation2 + $0x8] sm:$0xff] %vm50_vm0, %v1375_v56 }
 0x152   :  { %v872_v62 = vld [vmem:[#allocation4 + $0x20] sm:$0xff]  ;;  %797 = vst.msk [vmem:[#allocation2 + $0x68] sm:$0xff] %vm50_vm0, %v1384_v61 }
 0x153   :  { %888 = vst.msk [vmem:[%s1813_s4 + $0x20] sm:$0xff] %vm50_vm0, %v872_v62  ;;  %v815_v1 = vld [vmem:[#allocation2 + $0x60] sm:$0xff]  ;;  %v1448_v62 = vld [vmem:[#allocation2 + $0x70] sm:$0xff] }
 0x154   :  { %832 = vst.msk [vmem:[%s1811_s2 + $0x60] sm:$0xff] %vm50_vm0, %v815_v1  ;;  %v880_v4 = vld [vmem:[#allocation4 + $0x60] sm:$0xff] }
 0x155   :  { %896 = vst.msk [vmem:[%s1813_s4 + $0x60] sm:$0xff] %vm50_vm0, %v880_v4  ;;  %v319_v7 = vpop.xlane.xlu2 %318  ;;  %v737_v8 = vpop.xlane.xlu0 %736 }
 0x156   :  { %v1411_v11 = vmax.f32 %v1398_v2, %v319_v7  ;;  %v760_v18 = vadd.f32 %v737_v8, %v696_v9 }
 0x157   :  { %v811_v12 = vld [vmem:[#allocation2 + $0x40] sm:$0xff]  ;;  %v313_v13 = vpop.xlane.xlu1 %312 }
 0x158   :  { %828 = vst.msk [vmem:[%s1811_s2 + $0x40] sm:$0xff] %vm50_vm0, %v811_v12  ;;  %v804_v16 = vld [vmem:[#allocation2 + $0x8] sm:$0xff]  ;;  %v1420_v24 = vmax.f32 %v1408_v10, %v313_v13  ;;  %436 = vperm.xlu2 %1033, %v1411_v11   ;;  %v694_v12 = vld [vmem:[#allocation4 + $0x30] sm:$0xff] }
 0x159   :  { %821 = vst.msk [vmem:[%s1811_s2 + $0x8] sm:$0xff] %vm50_vm0, %v804_v16  ;;  %v816_v27 = vld [vmem:[#allocation2 + $0x68] sm:$0xff] }
 0x15a   :  { %833 = vst.msk [vmem:[%s1811_s2 + $0x68] sm:$0xff] %vm50_vm0, %v816_v27 }
 0x15b   :  { %789 = vst.msk [vmem:[#allocation2 + $0x28] sm:$0xff] %vm50_vm0, %v1411_v11 }
 0x15c   :  { %776 = vst.msk [vmem:[#allocation4 + $0x40] sm:$0xff] %vm50_vm0, %v760_v18 }
 0x15d   :  { %786 = vst.msk [vmem:[#allocation2 + $0x10] sm:$0xff] %vm50_vm0, %v1420_v24  ;;  %v731_v37 = vpop.xlane.xlu0 %730  ;;  %v723_v38 = vpop.xlane.xlu2 %722 }
 0x15e   :  { %v757_v42 = vadd.f32 %v731_v37, %v693_v31  ;;  %v753_v43 = vadd.f32 %v723_v38, %v689_v32  ;;  %v1483_v38 = vld [vmem:[#allocation2 + $0x30] sm:$0xff] }
 0x15f   :  { %v739_v45 = vpop.xlane.xlu1 %738 }
 0x160   :  { %773 = vst.msk [vmem:[#allocation4 + $0x28] sm:$0xff] %vm50_vm0, %v757_v42  ;;  %v761_v47 = vadd.f32 %v739_v45, %v697_v39  ;;  %476 = vperm.xlu2 %1033, %v1384_v61   ;;  %v698_v39 = vld [vmem:[#allocation4 + $0x50] sm:$0xff] }
 0x161   :  { %769 = vst.msk [vmem:[#allocation4 + $0x8] sm:$0xff] %vm50_vm0, %v753_v43  ;;  %v1488_v45 = vld [vmem:[#allocation2 + $0x50] sm:$0xff] }
 0x162   :  { %v808_v50 = vld [vmem:[#allocation2 + $0x28] sm:$0xff]  ;;  %777 = vst.msk [vmem:[#allocation4 + $0x48] sm:$0xff] %vm50_vm0, %v761_v47 }
 0x163   :  { %825 = vst.msk [vmem:[%s1811_s2 + $0x28] sm:$0xff] %vm50_vm0, %v808_v50  ;;  %v876_v51 = vld [vmem:[#allocation4 + $0x40] sm:$0xff] }
 0x164   :  { %892 = vst.msk [vmem:[%s1813_s4 + $0x40] sm:$0xff] %vm50_vm0, %v876_v51  ;;  %v805_v1 = vld [vmem:[#allocation2 + $0x10] sm:$0xff] }
 0x165   :  { %822 = vst.msk [vmem:[%s1811_s2 + $0x10] sm:$0xff] %vm50_vm0, %v805_v1  ;;  %v327_v4 = vpop.xlane.xlu0 %326  ;;  %v337_v7 = vpop.xlane.xlu2 %336 }
 0x166   :  { %v1459_v8 = vmax.f32 %v1446_v58, %v327_v4  ;;  %v1462_v9 = vmax.f32 %v1448_v62, %v337_v7 }
 0x167   :  { %v873_v13 = vld [vmem:[#allocation4 + $0x28] sm:$0xff]  ;;  %v733_v16 = vpop.xlane.xlu1 %732 }
 0x168   :  { %889 = vst.msk [vmem:[%s1813_s4 + $0x28] sm:$0xff] %vm50_vm0, %v873_v13  ;;  %v869_v18 = vld [vmem:[#allocation4 + $0x8] sm:$0xff]  ;;  %456 = vperm.xlu0 %1032, %v1459_v8   ;;  %v758_v37 = vadd.f32 %v733_v16, %v694_v12 }
 0x169   :  { %885 = vst.msk [vmem:[%s1813_s4 + $0x8] sm:$0xff] %vm50_vm0, %v869_v18  ;;  %v877_v32 = vld [vmem:[#allocation4 + $0x48] sm:$0xff]  ;;  %v695_v18 = vld [vmem:[#allocation4 + $0x38] sm:$0xff] }
 0x16a   :  { %893 = vst.msk [vmem:[%s1813_s4 + $0x48] sm:$0xff] %vm50_vm0, %v877_v32 }
 0x16b   :  { %793 = vst.msk [vmem:[#allocation2 + $0x48] sm:$0xff] %vm50_vm0, %v1459_v8 }
 0x16c   :  { %798 = vst.msk [vmem:[#allocation2 + $0x70] sm:$0xff] %vm50_vm0, %v1462_v9 }
 0x16d   :  { %774 = vst.msk [vmem:[#allocation4 + $0x30] sm:$0xff] %vm50_vm0, %v758_v37  ;;  %v321_v42 = vpop.xlane.xlu0 %320  ;;  %v741_v43 = vpop.xlane.xlu2 %740 }
 0x16e   :  { %v1491_v47 = vmax.f32 %v1483_v38, %v321_v42  ;;  %v762_v50 = vadd.f32 %v741_v43, %v698_v39  ;;  %v690_v39 = vld [vmem:[#allocation4 + $0x10] sm:$0xff]  ;;  %v1520_v42 = vld [vmem:[#allocation2 + $0x18] sm:$0xff] }
 0x16f   :  { %v329_v51 = vpop.xlane.xlu1 %328 }
 0x170   :  { %790 = vst.msk [vmem:[#allocation2 + $0x30] sm:$0xff] %vm50_vm0, %v1491_v47  ;;  %v1498_v4 = vmax.f32 %v1488_v45, %v329_v51  ;;  %421 = vperm.xlu0 %1032, %v1420_v24   ;;  %441 = vperm.xlu1 %1031, %v1491_v47  }
 0x171   :  { %778 = vst.msk [vmem:[#allocation4 + $0x50] sm:$0xff] %vm50_vm0, %v762_v50 }
 0x172   :  { %v812_v7 = vld [vmem:[#allocation2 + $0x48] sm:$0xff]  ;;  %794 = vst.msk [vmem:[#allocation2 + $0x50] sm:$0xff] %vm50_vm0, %v1498_v4  ;;  %461 = vperm.xlu2 %1033, %v1498_v4  }
 0x173   :  { %829 = vst.msk [vmem:[%s1811_s2 + $0x48] sm:$0xff] %vm50_vm0, %v812_v7  ;;  %v817_v13 = vld [vmem:[#allocation2 + $0x70] sm:$0xff] }
 0x174   :  { %834 = vst.msk [vmem:[%s1811_s2 + $0x70] sm:$0xff] %vm50_vm0, %v817_v13  ;;  %v874_v16 = vld [vmem:[#allocation4 + $0x30] sm:$0xff] }
 0x175   :  { %890 = vst.msk [vmem:[%s1813_s4 + $0x30] sm:$0xff] %vm50_vm0, %v874_v16  ;;  %v735_v32 = vpop.xlane.xlu2 %734  ;;  %v725_v37 = vpop.xlane.xlu0 %724 }
 0x176   :  { %v759_v50 = vadd.f32 %v735_v32, %v695_v18  ;;  %v754_v13 = vadd.f32 %v725_v37, %v690_v39  ;;  %v1542_v32 = vld [vmem:[#allocation2 + $0x58] sm:$0xff] }
 0x177   :  { %v809_v43 = vld [vmem:[#allocation2 + $0x30] sm:$0xff]  ;;  %v315_v51 = vpop.xlane.xlu1 %314  ;;  %v1544_v37 = vld [vmem:[#allocation2 + $0x78] sm:$0xff] }
 0x178   :  { %826 = vst.msk [vmem:[%s1811_s2 + $0x30] sm:$0xff] %vm50_vm0, %v809_v43  ;;  %v878_v7 = vld [vmem:[#allocation4 + $0x50] sm:$0xff]  ;;  %v1527_v1 = vmax.f32 %v1520_v42, %v315_v51  ;;  %481 = vperm.xlu1 %1031, %v1462_v9   ;;  %v1549_v51 = vld [vmem:[#allocation2 + $0x38] sm:$0xff] }
 0x179   :  { %894 = vst.msk [vmem:[%s1813_s4 + $0x50] sm:$0xff] %vm50_vm0, %v878_v7  ;;  %v813_v16 = vld [vmem:[#allocation2 + $0x50] sm:$0xff] }
 0x17a   :  { %830 = vst.msk [vmem:[%s1811_s2 + $0x50] sm:$0xff] %vm50_vm0, %v813_v16  ;;  %426 = vperm.xlu2 %1033, %v1527_v1  }
 0x17b   :  { %775 = vst.msk [vmem:[#allocation4 + $0x38] sm:$0xff] %vm50_vm0, %v759_v50 }
 0x17c   :  { %770 = vst.msk [vmem:[#allocation4 + $0x10] sm:$0xff] %vm50_vm0, %v754_v13  ;;  %v699_v13 = vld [vmem:[#allocation4 + $0x58] sm:$0xff] }
 0x17d   :  { %787 = vst.msk [vmem:[#allocation2 + $0x18] sm:$0xff] %vm50_vm0, %v1527_v1  ;;  %v331_v39 = vpop.xlane.xlu2 %330  ;;  %v339_v43 = vpop.xlane.xlu0 %338 }
 0x17e   :  { %v1552_v7 = vmax.f32 %v1542_v32, %v331_v39  ;;  %v1555_v16 = vmax.f32 %v1544_v37, %v339_v43  ;;  %v691_v43 = vld [vmem:[#allocation4 + $0x18] sm:$0xff] }
 0x17f   :  { %v323_v50 = vpop.xlane.xlu1 %322 }
 0x180   :  { %795 = vst.msk [vmem:[#allocation2 + $0x58] sm:$0xff] %vm50_vm0, %v1552_v7  ;;  %v1564_v31 = vmax.f32 %v1549_v51, %v323_v50  ;;  %486 = vperm.xlu0 %1032, %v1555_v16   ;;  %466 = vperm.xlu1 %1031, %v1552_v7  }
 0x181   :  { %799 = vst.msk [vmem:[#allocation2 + $0x78] sm:$0xff] %vm50_vm0, %v1555_v16 }
 0x182   :  { %v875_v39 = vld [vmem:[#allocation4 + $0x38] sm:$0xff]  ;;  %791 = vst.msk [vmem:[#allocation2 + $0x38] sm:$0xff] %vm50_vm0, %v1564_v31  ;;  %446 = vperm.xlu2 %1033, %v1564_v31  }
 0x183   :  { %891 = vst.msk [vmem:[%s1813_s4 + $0x38] sm:$0xff] %vm50_vm0, %v875_v39  ;;  %v870_v50 = vld [vmem:[#allocation4 + $0x10] sm:$0xff] }
 0x184   :  { %886 = vst.msk [vmem:[%s1813_s4 + $0x10] sm:$0xff] %vm50_vm0, %v870_v50  ;;  %v806_v18 = vld [vmem:[#allocation2 + $0x18] sm:$0xff] }
 0x185   :  { %823 = vst.msk [vmem:[%s1811_s2 + $0x18] sm:$0xff] %vm50_vm0, %v806_v18  ;;  %v743_v30 = vpop.xlane.xlu0 %742 }
 0x186   :  { %v763_v12 = vadd.f32 %v743_v30, %v699_v13 }
 0x187   :  { %v814_v27 = vld [vmem:[#allocation2 + $0x58] sm:$0xff]  ;;  %v727_v63 = vpop.xlane.xlu1 %726 }
 0x188   :  { %831 = vst.msk [vmem:[%s1811_s2 + $0x58] sm:$0xff] %vm50_vm0, %v814_v27  ;;  %v818_v39 = vld [vmem:[#allocation2 + $0x78] sm:$0xff]  ;;  %v755_v17 = vadd.f32 %v727_v63, %v691_v43 }
 0x189   :  { %835 = vst.msk [vmem:[%s1811_s2 + $0x78] sm:$0xff] %vm50_vm0, %v818_v39  ;;  %v810_v50 = vld [vmem:[#allocation2 + $0x38] sm:$0xff] }
 0x18a   :  { %827 = vst.msk [vmem:[%s1811_s2 + $0x38] sm:$0xff] %vm50_vm0, %v810_v50 }
 0x18b   :  { %779 = vst.msk [vmem:[#allocation4 + $0x58] sm:$0xff] %vm50_vm0, %v763_v12  ;;  %v404_v12 = vlaneseq }
 0x18c   :  { %771 = vst.msk [vmem:[#allocation4 + $0x18] sm:$0xff] %vm50_vm0, %v755_v17 }
 0x18d   :  { %v1610_v50 = vand.u32 127, %v404_v12 }
 0x18f   :  { %vm408_vm1 = vcmp.lt.s32.totalorder %v1610_v50, 26 }
 0x192   :  { %v879_v30 = vld [vmem:[#allocation4 + $0x58] sm:$0xff] }
 0x193   :  { %895 = vst.msk [vmem:[%s1813_s4 + $0x58] sm:$0xff] %vm50_vm0, %v879_v30  ;;  %v871_v63 = vld [vmem:[#allocation4 + $0x18] sm:$0xff] }
 0x194   :  { %887 = vst.msk [vmem:[%s1813_s4 + $0x18] sm:$0xff] %vm50_vm0, %v871_v63 }
 0x1aa   :  { %v417_v27 = vpop.permute.xlu2 %416 }
 0x1ab   :  { %v490_v63 = vsub.f32 %v1214_v33, %v417_v27 }
 0x1b2   :  { %v412_v18 = vpop.permute.xlu1 %411  ;;  %v437_v17 = vpop.permute.xlu2 %436 }
 0x1b3   :  { %v489_v13 = vsub.f32 %v1198_v22, %v412_v18  ;;  %v507_v18 = vmul.f32 1.442695, %v490_v63 }
 0x1b5   :  { %v505_v43 = vmul.f32 1.442695, %v489_v13 }
 0x1b7   :  { %1034 = vpow2.f32 %v505_v43 }
 0x1ba   :  { %v472_v39 = vpop.permute.xlu0 %471  ;;  %v432_v30 = vpop.permute.xlu1 %431 }
 0x1bb   :  { %v501_v60 = vsub.f32 %v1207_v29, %v472_v39  ;;  %v493_v59 = vsub.f32 %v1200_v23, %v432_v30  ;;  %v477_v43 = vpop.permute.xlu2 %476  ;;  %v494_v23 = vsub.f32 %v1226_v40, %v437_v17 }
 0x1bc   :  { %v502_v33 = vsub.f32 %v1220_v36, %v477_v43 }
 0x1bd   :  { %v529_v25 = vmul.f32 1.442695, %v501_v60  ;;  %v1035_v44 = vpop.eup %1034  ;;  %v513_v26 = vmul.f32 1.442695, %v493_v59 }
 0x1be   :  { %v539_v22 = vsel %vm408_vm1, %v1035_v44, 0.0  ;;  %v531_v44 = vmul.f32 1.442695, %v502_v33 }
 0x1bf   :  { %1036 = vpow2.f32 %v529_v25  ;;  %623 = vadd.xlane.f32.xlu2 %v539_v22 }
 0x1c0   :  { %1038 = vpow2.f32 %v513_v26  ;;  %v515_v26 = vmul.f32 1.442695, %v494_v23 }
 0x1c1   :  { %1040 = vpow2.f32 %v507_v18 }
 0x1c2   :  { %v452_v13 = vpop.permute.xlu1 %451 }
 0x1c3   :  { %v497_v29 = vsub.f32 %v1216_v34, %v452_v13 }
 0x1c5   :  { %v1037_v12 = vpop.eup %1036  ;;  %v521_v60 = vmul.f32 1.442695, %v497_v29 }
 0x1c6   :  { %v551_v59 = vsel %vm408_vm1, %v1037_v12, 0.0  ;;  %v1039_v39 = vpop.eup %1038 }
 0x1c7   :  { %647 = vadd.xlane.f32.xlu0 %v551_v59  ;;  %1042 = vpow2.f32 %v521_v60  ;;  %v543_v25 = vsel %vm408_vm1, %v1039_v39, 0.0  ;;  %v1041_v27 = vpop.eup %1040 }
 0x1c8   :  { %631 = vadd.xlane.f32.xlu1 %v543_v25  ;;  %1044 = vpow2.f32 %v515_v26  ;;  %v540_v63 = vsel %vm408_vm1, %v1041_v27, 0.0 }
 0x1c9   :  { %1046 = vpow2.f32 %v531_v44 }
 0x1cc   :  { %v462_v34 = vpop.permute.xlu2 %461 }
 0x1cd   :  { %v1043_v30 = vpop.eup %1042  ;;  %v499_v40 = vsub.f32 %v1247_v57, %v462_v34 }
 0x1ce   :  { %v547_v17 = vsel %vm408_vm1, %v1043_v30, 0.0  ;;  %v1045_v18 = vpop.eup %1044 }
 0x1cf   :  { %639 = vadd.xlane.f32.xlu2 %v547_v17  ;;  %v525_v22 = vmul.f32 1.442695, %v499_v40  ;;  %v1047_v43 = vpop.eup %1046  ;;  %v544_v29 = vsel %vm408_vm1, %v1045_v18, 0.0 }
 0x1d0   :  { %625 = vadd.xlane.f32.xlu1 %v540_v63  ;;  %v552_v12 = vsel %vm408_vm1, %v1047_v43, 0.0 }
 0x1d1   :  { %1048 = vpow2.f32 %v525_v22 }
 0x1d4   :  { %v427_v13 = vpop.permute.xlu2 %426 }
 0x1d7   :  { %633 = vadd.xlane.f32.xlu2 %v544_v29  ;;  %v1049_v59 = vpop.eup %1048 }
 0x1d8   :  { %649 = vadd.xlane.f32.xlu1 %v552_v12  ;;  %v549_v26 = vsel %vm408_vm1, %v1049_v59, 0.0 }
 0x1da   :  { %v457_v57 = vpop.permute.xlu0 %456 }
 0x1db   :  { %v498_v23 = vsub.f32 %v1233_v46, %v457_v57 }
 0x1dc   :  { %v447_v60 = vpop.permute.xlu2 %446 }
 0x1dd   :  { %v523_v39 = vmul.f32 1.442695, %v498_v23  ;;  %v496_v33 = vsub.f32 %v1262_v0, %v447_v60  ;;  %v574_v0 = vunpack.c.3.s8 %v1196_v21 }
 0x1df   :  { %1050 = vpow2.f32 %v523_v39  ;;  %v519_v25 = vmul.f32 1.442695, %v496_v33  ;;  %v590_v29 = vcvt.s32.f32 %v574_v0 }
 0x1e0   :  { %643 = vadd.xlane.f32.xlu1 %v549_v26 }
 0x1e1   :  { %1052 = vpow2.f32 %v519_v25  ;;  %v719_v60 = vmul.f32 %v590_v29, %v1278_v5 }
 0x1e2   :  { %v422_v44 = vpop.permute.xlu0 %421  ;;  %v442_v34 = vpop.permute.xlu1 %441 }
 0x1e3   :  { %v491_v27 = vsub.f32 %v1228_v41, %v422_v44  ;;  %v495_v46 = vsub.f32 %v1239_v52, %v442_v34  ;;  %v492_v52 = vsub.f32 %v1272_v3, %v427_v13 }
 0x1e5   :  { %v1051_v30 = vpop.eup %1050  ;;  %v509_v40 = vmul.f32 1.442695, %v491_v27  ;;  %v517_v18 = vmul.f32 1.442695, %v495_v46  ;;  %v511_v59 = vmul.f32 1.442695, %v492_v52 }
 0x1e6   :  { %v548_v17 = vsel %vm408_vm1, %v1051_v30, 0.0 }
 0x1e7   :  { %v1053_v63 = vpop.eup %1052  ;;  %1054 = vpow2.f32 %v509_v40  ;;  %641 = vadd.xlane.f32.xlu0 %v548_v17 }
 0x1e8   :  { %v546_v22 = vsel %vm408_vm1, %v1053_v63, 0.0  ;;  %1056 = vpow2.f32 %v517_v18  ;;  %v572_v18 = vunpack.c.1.s8 %v1196_v21 }
 0x1e9   :  { %637 = vadd.xlane.f32.xlu1 %v546_v22 }
 0x1ea   :  { %v482_v43 = vpop.permute.xlu1 %481 }
 0x1eb   :  { %v503_v41 = vsub.f32 %v1242_v54, %v482_v43 }
 0x1ed   :  { %v1055_v12 = vpop.eup %1054  ;;  %v533_v57 = vmul.f32 1.442695, %v503_v41  ;;  %v588_v41 = vcvt.s32.f32 %v572_v18 }
 0x1ee   :  { %v541_v23 = vsel %vm408_vm1, %v1055_v12, 0.0  ;;  %v1057_v25 = vpop.eup %1056  ;;  %v1814_v12 = vsub.f32 %v1322_v15, %v1328_v20  ;;  %v1817_v15 = vsub.f32 %v1362_v48, %v1372_v55  ;;  %v1819_v48 = vsub.f32 %v1398_v2, %v1411_v11  ;;  %v592_v2 = vld [vmem:[#allocation3 + $0x8] sm:$0xff] }
 0x1ef   :  { %1058 = vpow2.f32 %v533_v57  ;;  %627 = vadd.xlane.f32.xlu0 %v541_v23  ;;  %v545_v13 = vsel %vm408_vm1, %v1057_v25, 0.0  ;;  %v717_v29 = vmul.f32 %v588_v41, %v1220_v36  ;;  %v1815_v57 = vsub.f32 %v1340_v28, %v1343_v35  ;;  %v595_v25 = vld [vmem:[#allocation3 + $0x20] sm:$0xff] }
 0x1f0   :  { %1060 = vpow2.f32 %v511_v59  ;;  %v372_v52 = vmul.f32 1.442695, %v1814_v12  ;;  %v388_v20 = vmul.f32 1.442695, %v1817_v15  ;;  %v1818_v28 = vsub.f32 %v1364_v49, %v1375_v56 }
 0x1f1   :  { %750 = vadd.xlane.f32.xlu1 %v719_v60  ;;  %v591_v60 = vld [vmem:[#allocation3] sm:$0xff]  ;;  %v382_v55 = vmul.f32 1.442695, %v1819_v48  ;;  %v1820_v56 = vsub.f32 %v1369_v53, %v1384_v61 }
 0x1f2   :  { %v487_v39 = vpop.permute.xlu0 %486  ;;  %v467_v33 = vpop.permute.xlu1 %466  ;;  %v374_v35 = vmul.f32 1.442695, %v1818_v28 }
 0x1f3   :  { %v504_v26 = vsub.f32 %v1278_v5, %v487_v39  ;;  %v500_v3 = vsub.f32 %v1280_v6, %v467_v33  ;;  %v573_v5 = vunpack.c.2.s8 %v1196_v21  ;;  %v1816_v21 = vsub.f32 %v1320_v14, %v1325_v19  ;;  %v603_v14 = vld [vmem:[#allocation3 + $0x60] sm:$0xff] }
 0x1f5   :  { %v1059_v44 = vpop.eup %1058  ;;  %v535_v34 = vmul.f32 1.442695, %v504_v26  ;;  %v527_v30 = vmul.f32 1.442695, %v500_v3  ;;  %v589_v63 = vcvt.s32.f32 %v573_v5  ;;  %v380_v50 = vmul.f32 1.442695, %v1816_v21 }
 0x1f6   :  { %v553_v27 = vsel %vm408_vm1, %v1059_v44, 0.0  ;;  %v1061_v40 = vpop.eup %1060 }
 0x1f7   :  { %1062 = vpow2.f32 %v535_v34  ;;  %635 = vadd.xlane.f32.xlu0 %v545_v13  ;;  %651 = vadd.xlane.f32.xlu2 %v553_v27  ;;  %v542_v6 = vsel %vm408_vm1, %v1061_v40, 0.0  ;;  %v718_v22 = vmul.f32 %v589_v63, %v1242_v54  ;;  %v396_v54 = vmul.f32 1.442695, %v1815_v57 }
 0x1f8   :  { %1064 = vpow2.f32 %v527_v30  ;;  %v398_v30 = vmul.f32 1.442695, %v1820_v56 }
 0x1f9   :  { %1066 = vpow2.f32 %v372_v52  ;;  %v604_v52 = vld [vmem:[#allocation3 + $0x68] sm:$0xff] }
 0x1fa   :  { %1068 = vpow2.f32 %v396_v54 }
 0x1fb   :  { %1070 = vpow2.f32 %v380_v50 }
 0x1fc   :  { %1072 = vpow2.f32 %v388_v20 }
 0x1fd   :  { %v1063_v46 = vpop.eup %1062  ;;  %1074 = vpow2.f32 %v374_v35 }
 0x1fe   :  { %v554_v17 = vsel %vm408_vm1, %v1063_v46, 0.0  ;;  %v1065_v0 = vpop.eup %1064  ;;  %v599_v46 = vld [vmem:[#allocation3 + $0x40] sm:$0xff]  ;;  %1076 = vpow2.f32 %v382_v55  ;;  %v1826_v55 = vsub.f32 %v1483_v38, %v1491_v47  ;;  %v703_v38 = vld [vmem:[#allocation4 + $0x78] sm:$0xff] }
 0x1ff   :  { %653 = vadd.xlane.f32.xlu0 %v554_v17  ;;  %629 = vadd.xlane.f32.xlu2 %v542_v6  ;;  %v550_v43 = vsel %vm408_vm1, %v1065_v0, 0.0  ;;  %v1067_v23 = vpop.eup %1066  ;;  %1078 = vpow2.f32 %v398_v30 }
 0x200   :  { %v607_v59 = vmul.f32 %v1067_v23, %v591_v60  ;;  %v1069_v33 = vpop.eup %1068 }
 0x201   :  { %v1071_v19 = vpop.eup %1070  ;;  %v619_v26 = vmul.f32 %v1069_v33, %v603_v14 }
 0x202   :  { %v611_v3 = vmul.f32 %v1071_v19, %v595_v25  ;;  %v1073_v40 = vpop.eup %1072  ;;  %v600_v19 = vld [vmem:[#allocation3 + $0x48] sm:$0xff] }
 0x203   :  { %v1075_v5 = vpop.eup %1074  ;;  %v615_v11 = vmul.f32 %v1073_v40, %v599_v46  ;;  %v593_v40 = vld [vmem:[#allocation3 + $0x10] sm:$0xff] }
 0x204   :  { %v608_v6 = vmul.f32 %v1075_v5, %v592_v2  ;;  %v1077_v41 = vpop.eup %1076  ;;  %v1827_v5 = vsub.f32 %v1544_v37, %v1555_v16  ;;  %v605_v37 = vld [vmem:[#allocation3 + $0x70] sm:$0xff] }
 0x205   :  { %v1079_v12 = vpop.eup %1078 }
 0x206   :  { %v620_v21 = vmul.f32 %v1079_v12, %v604_v52  ;;  %v402_v2 = vmul.f32 1.442695, %v1827_v5  ;;  %v1829_v12 = vsub.f32 %v1542_v32, %v1552_v7 }
 0x207   :  { %748 = vadd.xlane.f32.xlu0 %v718_v22  ;;  %645 = vadd.xlane.f32.xlu2 %v550_v43  ;;  %v1821_v22 = vsub.f32 %v1488_v45, %v1498_v4  ;;  %v1822_v45 = vsub.f32 %v1446_v58, %v1459_v8  ;;  %v601_v58 = vld [vmem:[#allocation3 + $0x50] sm:$0xff] }
 0x208   :  { %v394_v52 = vmul.f32 1.442695, %v1829_v12 }
 0x209   :  { %v392_v18 = vmul.f32 1.442695, %v1821_v22  ;;  %v390_v4 = vmul.f32 1.442695, %v1822_v45 }
 0x20b   :  { %1080 = vpow2.f32 %v392_v18  ;;  %v597_v18 = vld [vmem:[#allocation3 + $0x30] sm:$0xff] }
 0x20c   :  { %1082 = vpow2.f32 %v390_v4 }
 0x20f   :  { %746 = vadd.xlane.f32.xlu2 %v717_v29  ;;  %v596_v29 = vld [vmem:[#allocation3 + $0x28] sm:$0xff] }
 0x210   :  { %v612_v57 = vmul.f32 %v1077_v41, %v596_v29 }
 0x211   :  { %v1081_v20 = vpop.eup %1080 }
 0x212   :  { %v617_v8 = vmul.f32 %v1081_v20, %v601_v58  ;;  %v1083_v35 = vpop.eup %1082  ;;  %v602_v58 = vld [vmem:[#allocation3 + $0x58] sm:$0xff] }
 0x232   :  { %v624_v36 = vpop.xlane.xlu2 %623 }
 0x233   :  { %v655_v39 = vadd.f32 %v624_v36, %v607_v59  ;;  %v1823_v36 = vsub.f32 %v1549_v51, %v1564_v31  ;;  %v1824_v31 = vsub.f32 %v1408_v10, %v1420_v24  ;;  %v616_v10 = vmul.f32 %v1083_v35, %v600_v19 }
 0x235   :  { %672 = vst.msk [vmem:[#allocation3] sm:$0xff] %vm50_vm0, %v655_v39  ;;  %v386_v39 = vmul.f32 1.442695, %v1823_v36  ;;  %v376_v51 = vmul.f32 1.442695, %v1824_v31 }
 0x237   :  { %1084 = vpow2.f32 %v386_v39 }
 0x238   :  { %1086 = vpow2.f32 %v376_v51 }
 0x23a   :  { %v648_v44 = vpop.xlane.xlu0 %647 }
 0x23b   :  { %v667_v34 = vadd.f32 %v648_v44, %v619_v26  ;;  %v632_v13 = vpop.xlane.xlu1 %631  ;;  %v598_v44 = vld [vmem:[#allocation3 + $0x38] sm:$0xff] }
 0x23c   :  { %v836_v27 = vld [vmem:[#allocation3] sm:$0xff]  ;;  %v659_v49 = vadd.f32 %v632_v13, %v611_v3 }
 0x23d   :  { %684 = vst.msk [vmem:[#allocation3 + $0x60] sm:$0xff] %vm50_vm0, %v667_v34  ;;  %v1085_v25 = vpop.eup %1084  ;;  %v1825_v34 = vsub.f32 %v1448_v62, %v1462_v9 }
 0x23e   :  { %852 = vst.msk [vmem:[%s1812_s3] sm:$0xff] %vm50_vm0, %v836_v27  ;;  %v614_v48 = vmul.f32 %v1085_v25, %v598_v44  ;;  %v384_v27 = vmul.f32 1.442695, %v1826_v55  ;;  %v1087_v30 = vpop.eup %1086  ;;  %v701_v25 = vld [vmem:[#allocation4 + $0x68] sm:$0xff] }
 0x23f   :  { %676 = vst.msk [vmem:[#allocation3 + $0x20] sm:$0xff] %vm50_vm0, %v659_v49  ;;  %v400_v3 = vmul.f32 1.442695, %v1825_v34  ;;  %v609_v62 = vmul.f32 %v1087_v30, %v593_v40 }
 0x241   :  { %1088 = vpow2.f32 %v400_v3 }
 0x242   :  { %v640_v17 = vpop.xlane.xlu2 %639  ;;  %1090 = vpow2.f32 %v384_v27 }
 0x243   :  { %v663_v0 = vadd.f32 %v640_v17, %v615_v11  ;;  %v626_v53 = vpop.xlane.xlu1 %625  ;;  %1092 = vpow2.f32 %v402_v2 }
 0x244   :  { %v848_v63 = vld [vmem:[#allocation3 + $0x60] sm:$0xff]  ;;  %v656_v61 = vadd.f32 %v626_v53, %v608_v6 }
 0x245   :  { %864 = vst.msk [vmem:[%s1812_s3 + $0x60] sm:$0xff] %vm50_vm0, %v848_v63  ;;  %v1828_v63 = vsub.f32 %v1520_v42, %v1527_v1 }
 0x246   :  { %v840_v43 = vld [vmem:[#allocation3 + $0x20] sm:$0xff]  ;;  %680 = vst.msk [vmem:[#allocation3 + $0x40] sm:$0xff] %vm50_vm0, %v663_v0 }
 0x247   :  { %856 = vst.msk [vmem:[%s1812_s3 + $0x20] sm:$0xff] %vm50_vm0, %v840_v43  ;;  %v1089_v6 = vpop.eup %1088  ;;  %v378_v0 = vmul.f32 1.442695, %v1828_v63 }
 0x248   :  { %673 = vst.msk [vmem:[#allocation3 + $0x8] sm:$0xff] %vm50_vm0, %v656_v61  ;;  %v1091_v61 = vpop.eup %1090  ;;  %v621_v42 = vmul.f32 %v1089_v6, %v605_v37 }
 0x249   :  { %1094 = vpow2.f32 %v378_v0  ;;  %v613_v1 = vmul.f32 %v1091_v61, %v597_v18 }
 0x24a   :  { %v634_v54 = vpop.xlane.xlu2 %633  ;;  %1096 = vpow2.f32 %v394_v52 }
 0x24b   :  { %v660_v50 = vadd.f32 %v634_v54, %v612_v57  ;;  %v650_v23 = vpop.xlane.xlu1 %649  ;;  %v1093_v54 = vpop.eup %1092 }
 0x24c   :  { %v668_v59 = vadd.f32 %v650_v23, %v620_v21  ;;  %v606_v21 = vld [vmem:[#allocation3 + $0x78] sm:$0xff] }
 0x24d   :  { %v844_v60 = vld [vmem:[#allocation3 + $0x40] sm:$0xff]  ;;  %677 = vst.msk [vmem:[#allocation3 + $0x28] sm:$0xff] %vm50_vm0, %v660_v50  ;;  %v594_v50 = vld [vmem:[#allocation3 + $0x18] sm:$0xff]  ;;  %v622_v32 = vmul.f32 %v1093_v54, %v606_v21 }
 0x24e   :  { %860 = vst.msk [vmem:[%s1812_s3 + $0x40] sm:$0xff] %vm50_vm0, %v844_v60 }
 0x24f   :  { %v837_v15 = vld [vmem:[#allocation3 + $0x8] sm:$0xff]  ;;  %685 = vst.msk [vmem:[#allocation3 + $0x68] sm:$0xff] %vm50_vm0, %v668_v59  ;;  %v1095_v45 = vpop.eup %1094 }
 0x250   :  { %853 = vst.msk [vmem:[%s1812_s3 + $0x8] sm:$0xff] %vm50_vm0, %v837_v15  ;;  %v610_v23 = vmul.f32 %v1095_v45, %v594_v50  ;;  %v1097_v15 = vpop.eup %1096 }
 0x251   :  { %v618_v31 = vmul.f32 %v1097_v15, %v602_v58 }
 0x253   :  { %v644_v33 = vpop.xlane.xlu1 %643 }
 0x254   :  { %v665_v28 = vadd.f32 %v644_v33, %v617_v8  ;;  %v841_v14 = vld [vmem:[#allocation3 + $0x28] sm:$0xff]  ;;  %v702_v8 = vld [vmem:[#allocation4 + $0x70] sm:$0xff] }
 0x255   :  { %857 = vst.msk [vmem:[%s1812_s3 + $0x28] sm:$0xff] %vm50_vm0, %v841_v14 }
 0x256   :  { %v849_v26 = vld [vmem:[#allocation3 + $0x68] sm:$0xff]  ;;  %682 = vst.msk [vmem:[#allocation3 + $0x50] sm:$0xff] %vm50_vm0, %v665_v28 }
 0x257   :  { %865 = vst.msk [vmem:[%s1812_s3 + $0x68] sm:$0xff] %vm50_vm0, %v849_v26 }
 0x25a   :  { %v642_v24 = vpop.xlane.xlu0 %641 }
 0x25b   :  { %v664_v13 = vadd.f32 %v642_v24, %v616_v10 }
 0x25c   :  { %v638_v49 = vpop.xlane.xlu1 %637 }
 0x25d   :  { %681 = vst.msk [vmem:[#allocation3 + $0x48] sm:$0xff] %vm50_vm0, %v664_v13  ;;  %v662_v56 = vadd.f32 %v638_v49, %v614_v48  ;;  %v846_v46 = vld [vmem:[#allocation3 + $0x50] sm:$0xff] }
 0x25e   :  { %862 = vst.msk [vmem:[%s1812_s3 + $0x50] sm:$0xff] %vm50_vm0, %v846_v46 }
 0x25f   :  { %679 = vst.msk [vmem:[#allocation3 + $0x38] sm:$0xff] %vm50_vm0, %v662_v56 }
 0x262   :  { %v628_v9 = vpop.xlane.xlu0 %627 }
 0x263   :  { %v657_v47 = vadd.f32 %v628_v9, %v609_v62 }
 0x264   :  { %v845_v11 = vld [vmem:[#allocation3 + $0x48] sm:$0xff]  ;;  %v751_v17 = vpop.xlane.xlu1 %750 }
 0x265   :  { %861 = vst.msk [vmem:[%s1812_s3 + $0x48] sm:$0xff] %vm50_vm0, %v845_v11  ;;  %v767_v53 = vadd.f32 %v751_v17, %v703_v38 }
 0x266   :  { %v843_v22 = vld [vmem:[#allocation3 + $0x38] sm:$0xff]  ;;  %674 = vst.msk [vmem:[#allocation3 + $0x10] sm:$0xff] %vm50_vm0, %v657_v47 }
 0x267   :  { %859 = vst.msk [vmem:[%s1812_s3 + $0x38] sm:$0xff] %vm50_vm0, %v843_v22 }
 0x268   :  { %783 = vst.msk [vmem:[#allocation4 + $0x78] sm:$0xff] %vm50_vm0, %v767_v53 }
 0x26a   :  { %v636_v16 = vpop.xlane.xlu0 %635  ;;  %v652_v43 = vpop.xlane.xlu2 %651 }
 0x26b   :  { %v661_v41 = vadd.f32 %v636_v16, %v613_v1  ;;  %v669_v29 = vadd.f32 %v652_v43, %v621_v42 }
 0x26d   :  { %v838_v57 = vld [vmem:[#allocation3 + $0x10] sm:$0xff]  ;;  %678 = vst.msk [vmem:[#allocation3 + $0x30] sm:$0xff] %vm50_vm0, %v661_v41 }
 0x26e   :  { %854 = vst.msk [vmem:[%s1812_s3 + $0x10] sm:$0xff] %vm50_vm0, %v838_v57 }
 0x26f   :  { %v883_v4 = vld [vmem:[#allocation4 + $0x78] sm:$0xff]  ;;  %686 = vst.msk [vmem:[#allocation3 + $0x70] sm:$0xff] %vm50_vm0, %v669_v29 }
 0x270   :  { %899 = vst.msk [vmem:[%s1813_s4 + $0x78] sm:$0xff] %vm50_vm0, %v883_v4 }
 0x272   :  { %v654_v7 = vpop.xlane.xlu0 %653  ;;  %v630_v60 = vpop.xlane.xlu2 %629 }
 0x273   :  { %v670_v59 = vadd.f32 %v654_v7, %v622_v32  ;;  %v658_v39 = vadd.f32 %v630_v60, %v610_v23 }
 0x274   :  { %v842_v36 = vld [vmem:[#allocation3 + $0x30] sm:$0xff] }
 0x275   :  { %858 = vst.msk [vmem:[%s1812_s3 + $0x30] sm:$0xff] %vm50_vm0, %v842_v36 }
 0x276   :  { %v850_v20 = vld [vmem:[#allocation3 + $0x70] sm:$0xff]  ;;  %687 = vst.msk [vmem:[#allocation3 + $0x78] sm:$0xff] %vm50_vm0, %v670_v59 }
 0x277   :  { %866 = vst.msk [vmem:[%s1812_s3 + $0x70] sm:$0xff] %vm50_vm0, %v850_v20 }
 0x278   :  { %675 = vst.msk [vmem:[#allocation3 + $0x18] sm:$0xff] %vm50_vm0, %v658_v39 }
 0x27a   :  { %v749_v51 = vpop.xlane.xlu0 %748  ;;  %v646_v33 = vpop.xlane.xlu2 %645 }
 0x27b   :  { %v766_v28 = vadd.f32 %v749_v51, %v702_v8  ;;  %v666_v35 = vadd.f32 %v646_v33, %v618_v31 }
 0x27d   :  { %v851_v14 = vld [vmem:[#allocation3 + $0x78] sm:$0xff]  ;;  %782 = vst.msk [vmem:[#allocation4 + $0x70] sm:$0xff] %vm50_vm0, %v766_v28 }
 0x27e   :  { %867 = vst.msk [vmem:[%s1812_s3 + $0x78] sm:$0xff] %vm50_vm0, %v851_v14 }
 0x27f   :  { %v839_v19 = vld [vmem:[#allocation3 + $0x18] sm:$0xff]  ;;  %683 = vst.msk [vmem:[#allocation3 + $0x58] sm:$0xff] %vm50_vm0, %v666_v35 }
 0x280   :  { %855 = vst.msk [vmem:[%s1812_s3 + $0x18] sm:$0xff] %vm50_vm0, %v839_v19 }
 0x282   :  { %v747_v26 = vpop.xlane.xlu2 %746 }
 0x283   :  { %v765_v44 = vadd.f32 %v747_v26, %v701_v25 }
 0x284   :  { %v882_v10 = vld [vmem:[#allocation4 + $0x70] sm:$0xff] }
 0x285   :  { %898 = vst.msk [vmem:[%s1813_s4 + $0x70] sm:$0xff] %vm50_vm0, %v882_v10 }
 0x286   :  { %v847_v24 = vld [vmem:[#allocation3 + $0x58] sm:$0xff]  ;;  %781 = vst.msk [vmem:[#allocation4 + $0x68] sm:$0xff] %vm50_vm0, %v765_v44 }
 0x287   :  { %863 = vst.msk [vmem:[%s1812_s3 + $0x58] sm:$0xff] %vm50_vm0, %v847_v24 }
 0x28d   :  { %v881_v34 = vld [vmem:[#allocation4 + $0x68] sm:$0xff] }
 0x28e   :  { %897 = vst.msk [vmem:[%s1813_s4 + $0x68] sm:$0xff] %vm50_vm0, %v881_v34 }
 0x28f   :  { %912 = vsyncpa [#allocation6], 1 }
 0x290   :  { %913 = vsyncpa [#allocation8], 1 }

</bundles_post_ra>
